<compile_context>
chip_gen: v7x
topology: tpu7x:2x2x1
jax: 0.10.0
libtpu: 0.0.40
codegen_flags: <defaults>
</compile_context>

<pallas_src>
import functools

import jax
import jax.numpy as jnp
from jax.experimental import pallas as pl
from jax.experimental.pallas import tpu as pltpu

_LANE = 128


def _round_up(x, m):
    return ((x + m - 1) // m) * m


def _tpu_generation():
    """Best-effort TPU generation (drives VMEM cap and 3x3-conv strategy)."""
    try:
        kind = jax.devices()[0].device_kind.lower()
    except Exception:
        return 6
    if "v7" in kind or "7x" in kind:
        return 7
    if "v6" in kind:
        return 6
    if "v5" in kind:
        return 5
    if "v4" in kind:
        return 4
    return 6


def _vmem_need_bytes(Th, W, Cp, Cm, fused):
    """Per-grid-step VMEM estimate INCLUDING the in-kernel temporaries."""
    img = Th * W * Cp * 4
    halo = W * Cp * 4
    blocks = 2 * (2 * img + 2 * halo)                       # dbl-buffered x/out + halos
    weights = 2 * ((Cp * Cm + 9 * Cm * Cp) * 2 + (Cm + Cp) * 4)
    tmp = ((Th + 2) * W * Cp * 2                            # x_ext (bf16)
           + (Th + 2) * W * Cm * 4                          # mid (f32 matmul result)
           + (Th + 2) * (W + 2) * Cm * 2                    # mid_pad (bf16)
           + 2 * Th * W * Cp * 4)                           # f32 acc + pre-store out
    if fused:
        tmp += Th * W * 9 * Cm * 2                          # bf16 im2col patch
    return blocks + weights + tmp


def _choose_strip_height(N, H, W, Cp, Cm, fused, cap_bytes):
    """Largest divisor of H whose per-step working set fits the VMEM cap and
    that still yields >= 4 total parallel steps (2 per TensorCore on v7x)."""
    divisors = [t for t in range(H, 0, -1) if H % t == 0]
    fitting = [t for t in divisors
               if int(1.25 * _vmem_need_bytes(t, W, Cp, Cm, fused)) <= cap_bytes]
    if not fitting:
        fitting = [1]
    for t in fitting:                                       # largest first
        if N * (H // t) >= 4:
            return t
    return fitting[0]


def _residual_kernel(x_ref, top_ref, bot_ref, w1_ref, b1_ref, w3_ref, b3_ref,
                     o_ref, *, fused_patch):
    # x_ref:   (1, Th, W, Cp) f32   one row strip of one batch element
    # top_ref: (1, 1,  W, Cp) f32   row just above the strip (zeros for strip 0)
    # bot_ref: (1, 1,  W, Cp) f32   row just below the strip (zeros for last strip)
    # w1_ref:  (Cp, Cm)       bf16  1x1 conv weight, BN1 scale folded, channel-padded
    # b1_ref:  (1, Cm)        f32   BN1 folded bias
    # w3_ref:  (9*Cm, Cp)     bf16  3x3 conv weight (ki,kj,Cm flattened), BN2 folded
    # b3_ref:  (1, Cp)        f32   BN2 folded bias
    # o_ref:   (1, Th, W, Cp) f32
    _, Th, W, Cp = x_ref.shape
    Cm = w1_ref.shape[1]
    s = pl.program_id(1)
    n_strips = pl.num_programs(1)

    x = x_ref[0].reshape(Th * W, Cp)                        # f32, residual input

    # ---- 1x1 conv over the strip plus its 2 halo rows (one MXU matmul) ----
    x_ext = jnp.concatenate([top_ref[0, 0], x, bot_ref[0, 0]], axis=0)
    mid = jnp.dot(x_ext.astype(jnp.bfloat16), w1_ref[...],
                  preferred_element_type=jnp.float32)       # ((Th+2)*W, Cm)
    mid = jnp.clip(mid + b1_ref[...], 0.0, 6.0)

    # Halo rows outside the image are the 3x3 conv's zero padding (NOT
    # ReLU6(b1)): zero them.  One VPU select over the mid strip.
    row = jax.lax.broadcasted_iota(jnp.int32, ((Th + 2) * W, 1), 0)
    keep = ((row >= W) | (s > 0)) & ((row < (Th + 1) * W) | (s < n_strips - 1))
    mid = jnp.where(keep, mid, 0.0)

    # bf16 mid, zero columns left/right (halo rows already give the H padding).
    mid = mid.astype(jnp.bfloat16).reshape(Th + 2, W, Cm)
    zcol = jnp.zeros((Th + 2, 1, Cm), jnp.bfloat16)
    mid_pad = jnp.concatenate([zcol, mid, zcol], axis=1)    # (Th+2, W+2, Cm)

    # ---- 3x3 conv ----
    if fused_patch:
        # v5e/v6e: single wide MXU contraction over a bf16 im2col patch.
        slabs = [mid_pad[ki:ki + Th, kj:kj + W, :]
                 for ki in range(3) for kj in range(3)]
        patch = jnp.concatenate(slabs, axis=-1).reshape(Th * W, 9 * Cm)
        acc = jnp.dot(patch, w3_ref[...], preferred_element_type=jnp.float32)
    else:
        # v7x: nine MRB-accumulated dots, no materialized patch (64 MiB VMEM).
        acc = jnp.zeros((Th * W, Cp), jnp.float32)
        for k in range(9):
            ki, kj = k // 3, k % 3
            slab = mid_pad[ki:ki + Th, kj:kj + W, :].reshape(Th * W, Cm)
            acc = acc + jnp.dot(slab, w3_ref[k * Cm:(k + 1) * Cm, :],
                                preferred_element_type=jnp.float32)

    # ---- folded BN bias + ReLU6 + residual add ----
    out = jnp.clip(acc + b3_ref[...], 0.0, 6.0)
    o_ref[0] = (out + x).reshape(Th, W, Cp)


@jax.jit
def residual_forward_nhwc(x_nhwc, w1s, b1, w3r, b3):
    """NHWC fast path.  w1s/b1/w3r/b3 come from fold_params (channel-padded)."""
    N, H, W, Cin = x_nhwc.shape
    Cp, Cm = w1s.shape                                      # padded Cin / Cmid

    gen = _tpu_generation()
    fused = gen < 7                                         # v7x uses 9 accumulating dots
    vmem_cap = (48 << 20) if gen >= 7 else (100 << 20)

    x = x_nhwc.astype(jnp.float32)
    if Cp != Cin:
        x = jnp.pad(x, ((0, 0), (0, 0), (0, 0), (0, Cp - Cin)))

    Th = _choose_strip_height(N, H, W, Cp, Cm, fused, vmem_cap)
    n_strips = H // Th

    # Per-strip halo rows (row above / below); out-of-image rows are zeros and
    # additionally masked inside the kernel.
    zrow = jnp.zeros((N, 1, W, Cp), jnp.float32)
    if n_strips > 1:
        halo_top = jnp.concatenate([zrow, x[:, Th - 1:H - 1:Th]], axis=1)
        halo_bot = jnp.concatenate([x[:, Th:H:Th], zrow], axis=1)
    else:
        halo_top, halo_bot = zrow, zrow

    grid_spec = pltpu.PrefetchScalarGridSpec(
        num_scalar_prefetch=0,
        grid=(N, n_strips),
        in_specs=[
            pl.BlockSpec((1, Th, W, Cp), lambda n, s: (n, s, 0, 0)),
            pl.BlockSpec((1, 1, W, Cp), lambda n, s: (n, s, 0, 0)),
            pl.BlockSpec((1, 1, W, Cp), lambda n, s: (n, s, 0, 0)),
            # Weights/biases are grid-invariant and stay resident in VMEM.
            # (Deliberately not using pipeline_mode=pl.Buffered(1): minor VMEM
            #  win, not worth the compile risk on this JAX pin.)
            pl.BlockSpec((Cp, Cm), lambda n, s: (0, 0)),
            pl.BlockSpec((1, Cm), lambda n, s: (0, 0)),
            pl.BlockSpec((9 * Cm, Cp), lambda n, s: (0, 0)),
            pl.BlockSpec((1, Cp), lambda n, s: (0, 0)),
        ],
        out_specs=pl.BlockSpec((1, Th, W, Cp), lambda n, s: (n, s, 0, 0)),
    )

    flops = 2 * N * H * W * (Cp * Cm + 9 * Cm * Cp)
    bytes_accessed = (2 * N * H * W * Cp * 4                 # x in + out (f32)
                      + 2 * N * n_strips * W * Cp * 4        # halo rows
                      + (Cp * Cm + 9 * Cm * Cp) * 2          # bf16 weights
                      + (Cm + Cp) * 4)                       # biases
    cost = pl.CostEstimate(flops=flops, transcendentals=0,
                           bytes_accessed=bytes_accessed)

    need = _vmem_need_bytes(Th, W, Cp, Cm, fused)
    vmem_limit = int(min(max(int(1.25 * need), 16 << 20), vmem_cap))

    out = pl.pallas_call(
        functools.partial(_residual_kernel, fused_patch=fused),
        out_shape=jax.ShapeDtypeStruct((N, H, W, Cp), jnp.float32),
        grid_spec=grid_spec,
        compiler_params=pltpu.CompilerParams(
            dimension_semantics=("parallel", "parallel"),
            vmem_limit_bytes=vmem_limit),
        cost_estimate=cost,
        input_output_aliases={0: 0},        # output reuses x's HBM buffer
    )(x, halo_top, halo_bot, w1s, b1, w3r, b3)

    return out[..., :Cin] if Cp != Cin else out


def fold_params(raw, eps=1e-5):
    """Fold eval-mode BatchNorm into the conv weights/biases and zero-pad the
    channel axes to multiples of 128 lanes (exact; padded channels stay 0)."""
    w1, w3 = raw["w1"], raw["w3"]                 # (Cin,Cmid), (3,3,Cmid,Cin) HWIO
    Cin, Cmid = w1.shape
    Cp, Cm = _round_up(Cin, _LANE), _round_up(Cmid, _LANE)

    s1 = raw["g1"] / jnp.sqrt(raw["v1"] + eps)
    b1 = raw["b1"] - raw["m1"] * s1
    s3 = raw["g3"] / jnp.sqrt(raw["v3"] + eps)
    b3 = raw["b3"] - raw["m3"] * s3

    w1s = jnp.zeros((Cp, Cm), jnp.float32).at[:Cin, :Cmid].set(w1 * s1[None, :])
    w3s = jnp.zeros((3, 3, Cm, Cp), jnp.float32).at[:, :, :Cmid, :Cin].set(
        w3 * s3[None, None, None, :])
    return {
        "w1s": w1s.astype(jnp.bfloat16),                               # (Cp, Cm)
        "b1": jnp.zeros((1, Cm), jnp.float32).at[0, :Cmid].set(b1),    # (1, Cm)
        "w3r": w3s.reshape(9 * Cm, Cp).astype(jnp.bfloat16),           # (9*Cm, Cp)
        "b3": jnp.zeros((1, Cp), jnp.float32).at[0, :Cin].set(b3),     # (1, Cp)
    }


def residual_forward(x_nchw, folded):
    """PyTorch-facing wrapper: NCHW in, NCHW out (layout converted once here)."""
    x_nhwc = jnp.transpose(x_nchw, (0, 2, 3, 1))
    out = residual_forward_nhwc(x_nhwc, folded["w1s"], folded["b1"],
                                folded["w3r"], folded["b3"])
    return jnp.transpose(out, (0, 3, 1, 2))


def residual_reference_nhwc(x_nhwc, raw, eps=1e-5):
    """Pure-JAX f32 reference (un-folded, un-padded params) for checking."""
    s1 = raw["g1"] / jnp.sqrt(raw["v1"] + eps)
    b1 = raw["b1"] - raw["m1"] * s1
    s3 = raw["g3"] / jnp.sqrt(raw["v3"] + eps)
    b3 = raw["b3"] - raw["m3"] * s3

    mid = jnp.einsum("nhwc,cd->nhwd", x_nhwc, raw["w1"])
    mid = jnp.clip(mid * s1 + b1, 0.0, 6.0)
    out = jax.lax.conv_general_dilated(
        mid, raw["w3"], window_strides=(1, 1), padding=((1, 1), (1, 1)),
        dimension_numbers=("NHWC", "HWIO", "NHWC"))
    out = jnp.clip(out * s3 + b3, 0.0, 6.0)
    return out + x_nhwc


def make_raw_params(key, in_channels):
    mid_channels = in_channels // 2
    ks = jax.random.split(key, 10)
    return {
        "w1": 0.1 * jax.random.normal(ks[0], (in_channels, mid_channels), jnp.float32),
        "w3": 0.1 * jax.random.normal(ks[1], (3, 3, mid_channels, in_channels), jnp.float32),
        "g1": 1.0 + 0.1 * jax.random.normal(ks[2], (mid_channels,), jnp.float32),
        "b1": 0.1 * jax.random.normal(ks[3], (mid_channels,), jnp.float32),
        "m1": 0.1 * jax.random.normal(ks[4], (mid_channels,), jnp.float32),
        "v1": 0.5 + jnp.abs(jax.random.normal(ks[5], (mid_channels,), jnp.float32)),
        "g3": 1.0 + 0.1 * jax.random.normal(ks[6], (in_channels,), jnp.float32),
        "b3": 0.1 * jax.random.normal(ks[7], (in_channels,), jnp.float32),
        "m3": 0.1 * jax.random.normal(ks[8], (in_channels,), jnp.float32),
        "v3": 0.5 + jnp.abs(jax.random.normal(ks[9], (in_channels,), jnp.float32)),
    }


if __name__ == "__main__":
    key = jax.random.PRNGKey(0)
    k_x, k_p = jax.random.split(key)

    N, C, H, W = 2, 4, 16, 16                      # in_channels=4 -> mid=2
    x_nchw = jax.random.normal(k_x, (N, C, H, W), jnp.float32)
    raw = make_raw_params(k_p, C)
    folded = fold_params(raw)

    out = residual_forward(x_nchw, folded)
    out = jax.block_until_ready(out)

    # Correctness check vs. a pure-JAX f32 reference (bf16 MXU -> looser tol).
    x_nhwc = jnp.transpose(x_nchw, (0, 2, 3, 1))
    ref_nchw = jnp.transpose(residual_reference_nhwc(x_nhwc, raw), (0, 3, 1, 2))
    assert out.shape == x_nchw.shape, (out.shape, x_nchw.shape)
    max_err = float(jnp.max(jnp.abs(out - ref_nchw)))
    assert jnp.allclose(out, ref_nchw, rtol=3e-2, atol=3e-2), max_err

    print("KERNEL_OK")
</pallas_src>

<mosaic_0001>
module attributes {stable_mosaic.version = 11 : i64} {
  func.func @_residual_kernel(%arg0: i32, %arg1: i32, %arg2: memref<1x8x16x128xf32, #tpu.memory_space<vmem>>, %arg3: memref<1x1x16x128xf32, #tpu.memory_space<vmem>>, %arg4: memref<1x1x16x128xf32, #tpu.memory_space<vmem>>, %arg5: memref<128x128xbf16, #tpu.memory_space<vmem>>, %arg6: memref<1x128xf32, #tpu.memory_space<vmem>>, %arg7: memref<1152x128xbf16, #tpu.memory_space<vmem>>, %arg8: memref<1x128xf32, #tpu.memory_space<vmem>>, %arg9: memref<1x8x16x128xf32, #tpu.memory_space<vmem>>) attributes {dimension_semantics = [#tpu.dimension_semantics<parallel>, #tpu.dimension_semantics<parallel>], iteration_bounds = array<i64: 2, 2>, scalar_prefetch = 0 : i64, scratch_operands = 0 : i64, tpu.core_type = #tpu.core_type<tc>, window_params = [{transform_indices = @transform_0, window_bounds = array<i64: 1, 8, 16, 128>}, {transform_indices = @transform_1, window_bounds = array<i64: 1, 1, 16, 128>}, {transform_indices = @transform_2, window_bounds = array<i64: 1, 1, 16, 128>}, {pipeline_mode = #tpu.pipeline_mode<synchronous>, transform_indices = @transform_3, window_bounds = array<i64: 128, 128>}, {pipeline_mode = #tpu.pipeline_mode<synchronous>, transform_indices = @transform_4, window_bounds = array<i64: 1, 128>}, {pipeline_mode = #tpu.pipeline_mode<synchronous>, transform_indices = @transform_5, window_bounds = array<i64: 1152, 128>}, {pipeline_mode = #tpu.pipeline_mode<synchronous>, transform_indices = @transform_6, window_bounds = array<i64: 1, 128>}, {transform_indices = @transform_7, window_bounds = array<i64: 1, 8, 16, 128>}]} {
    %c0 = arith.constant 0 : index
    %c0_0 = arith.constant 0 : index
    %c0_1 = arith.constant 0 : index
    %c0_2 = arith.constant 0 : index
    %0 = vector.load %arg2[%c0, %c0_0, %c0_1, %c0_2] : memref<1x8x16x128xf32, #tpu.memory_space<vmem>>, vector<1x8x16x128xf32>
    %1 = vector.shape_cast %0 : vector<1x8x16x128xf32> to vector<8x16x128xf32>
    %2 = vector.shape_cast %1 : vector<8x16x128xf32> to vector<128x128xf32>
    %c0_3 = arith.constant 0 : index
    %c0_4 = arith.constant 0 : index
    %c0_5 = arith.constant 0 : index
    %c0_6 = arith.constant 0 : index
    %3 = vector.load %arg3[%c0_3, %c0_4, %c0_5, %c0_6] : memref<1x1x16x128xf32, #tpu.memory_space<vmem>>, vector<1x1x16x128xf32>
    %4 = vector.shape_cast %3 : vector<1x1x16x128xf32> to vector<16x128xf32>
    %c0_7 = arith.constant 0 : index
    %c0_8 = arith.constant 0 : index
    %c0_9 = arith.constant 0 : index
    %c0_10 = arith.constant 0 : index
    %5 = vector.load %arg4[%c0_7, %c0_8, %c0_9, %c0_10] : memref<1x1x16x128xf32, #tpu.memory_space<vmem>>, vector<1x1x16x128xf32>
    %6 = vector.shape_cast %5 : vector<1x1x16x128xf32> to vector<16x128xf32>
    %7 = tpu.concatenate %4, %2, %6 in 0 : vector<16x128xf32>, vector<128x128xf32>, vector<16x128xf32> -> vector<160x128xf32>
    %8 = arith.truncf %7 : vector<160x128xf32> to vector<160x128xbf16>
    %c0_11 = arith.constant 0 : index
    %c0_12 = arith.constant 0 : index
    %9 = vector.load %arg5[%c0_11, %c0_12] : memref<128x128xbf16, #tpu.memory_space<vmem>>, vector<128x128xbf16>
    %cst = arith.constant dense<0.000000e+00> : vector<160x128xf32>
    %10 = tpu.matmul %8, %9, %cst {dimension_numbers = #tpu.dot_dimension_numbers<[1], [0], [0], [1], [0, 0, 1, 1], [], []>} : vector<160x128xbf16>, vector<128x128xbf16>, vector<160x128xf32> -> vector<160x128xf32>
    %c0_13 = arith.constant 0 : index
    %c0_14 = arith.constant 0 : index
    %11 = vector.load %arg6[%c0_13, %c0_14] : memref<1x128xf32, #tpu.memory_space<vmem>>, vector<1x128xf32>
    %12 = vector.broadcast %11 : vector<1x128xf32> to vector<160x128xf32>
    %13 = arith.addf %10, %12 : vector<160x128xf32>
    %cst_15 = arith.constant 0.000000e+00 : f32
    %cst_16 = arith.constant 6.000000e+00 : f32
    %14 = vector.broadcast %cst_15 : f32 to vector<160x128xf32>
    %15 = arith.maximumf %14, %13 : vector<160x128xf32>
    %16 = vector.broadcast %cst_16 : f32 to vector<160x128xf32>
    %17 = arith.minimumf %16, %15 : vector<160x128xf32>
    %18 = tpu.iota {dimensions = array<i32: 0>} : vector<160x1xi32>
    %c16_i32 = arith.constant 16 : i32
    %19 = vector.broadcast %c16_i32 : i32 to vector<160x1xi32>
    %20 = arith.cmpi sge, %18, %19 : vector<160x1xi32>
    %c0_i32 = arith.constant 0 : i32
    %21 = arith.cmpi sgt, %arg1, %c0_i32 : i32
    %22 = vector.broadcast %21 : i1 to vector<160x1xi1>
    %23 = arith.ori %20, %22 : vector<160x1xi1>
    %c144_i32 = arith.constant 144 : i32
    %24 = vector.broadcast %c144_i32 : i32 to vector<160x1xi32>
    %25 = arith.cmpi slt, %18, %24 : vector<160x1xi32>
    %c1_i32 = arith.constant 1 : i32
    %26 = arith.cmpi slt, %arg1, %c1_i32 : i32
    %27 = vector.broadcast %26 : i1 to vector<160x1xi1>
    %28 = arith.ori %25, %27 : vector<160x1xi1>
    %29 = arith.andi %23, %28 : vector<160x1xi1>
    %cst_17 = arith.constant 0.000000e+00 : f32
    %30 = vector.shape_cast %29 : vector<160x1xi1> to vector<160x1xi1>
    %31 = vector.broadcast %30 : vector<160x1xi1> to vector<160x128xi1>
    %32 = vector.broadcast %cst_17 : f32 to vector<160x128xf32>
    %33 = arith.select %31, %17, %32 : vector<160x128xi1>, vector<160x128xf32>
    %34 = arith.truncf %33 : vector<160x128xf32> to vector<160x128xbf16>
    %35 = vector.shape_cast %34 : vector<160x128xbf16> to vector<10x16x128xbf16>
    %cst_18 = arith.constant 0.000000e+00 : bf16
    %36 = vector.broadcast %cst_18 : bf16 to vector<10x1x128xbf16>
    %37 = tpu.concatenate %36, %35, %36 in 1 : vector<10x1x128xbf16>, vector<10x16x128xbf16>, vector<10x1x128xbf16> -> vector<10x18x128xbf16>
    %38 = vector.extract_strided_slice %37 {offsets = [0, 0, 0], sizes = [8, 16, 128], strides = [1, 1, 1]} : vector<10x18x128xbf16> to vector<8x16x128xbf16>
    %39 = vector.extract_strided_slice %37 {offsets = [0, 1, 0], sizes = [8, 16, 128], strides = [1, 1, 1]} : vector<10x18x128xbf16> to vector<8x16x128xbf16>
    %40 = vector.extract_strided_slice %37 {offsets = [0, 2, 0], sizes = [8, 16, 128], strides = [1, 1, 1]} : vector<10x18x128xbf16> to vector<8x16x128xbf16>
    %41 = vector.extract_strided_slice %37 {offsets = [1, 0, 0], sizes = [8, 16, 128], strides = [1, 1, 1]} : vector<10x18x128xbf16> to vector<8x16x128xbf16>
    %42 = vector.extract_strided_slice %37 {offsets = [1, 1, 0], sizes = [8, 16, 128], strides = [1, 1, 1]} : vector<10x18x128xbf16> to vector<8x16x128xbf16>
    %43 = vector.extract_strided_slice %37 {offsets = [1, 2, 0], sizes = [8, 16, 128], strides = [1, 1, 1]} : vector<10x18x128xbf16> to vector<8x16x128xbf16>
    %44 = vector.extract_strided_slice %37 {offsets = [2, 0, 0], sizes = [8, 16, 128], strides = [1, 1, 1]} : vector<10x18x128xbf16> to vector<8x16x128xbf16>
    %45 = vector.extract_strided_slice %37 {offsets = [2, 1, 0], sizes = [8, 16, 128], strides = [1, 1, 1]} : vector<10x18x128xbf16> to vector<8x16x128xbf16>
    %46 = vector.extract_strided_slice %37 {offsets = [2, 2, 0], sizes = [8, 16, 128], strides = [1, 1, 1]} : vector<10x18x128xbf16> to vector<8x16x128xbf16>
    %47 = tpu.concatenate %38, %39, %40, %41, %42, %43, %44, %45, %46 in 2 : vector<8x16x128xbf16>, vector<8x16x128xbf16>, vector<8x16x128xbf16>, vector<8x16x128xbf16>, vector<8x16x128xbf16>, vector<8x16x128xbf16>, vector<8x16x128xbf16>, vector<8x16x128xbf16>, vector<8x16x128xbf16> -> vector<8x16x1152xbf16>
    %48 = vector.shape_cast %47 : vector<8x16x1152xbf16> to vector<128x1152xbf16>
    %c0_19 = arith.constant 0 : index
    %c0_20 = arith.constant 0 : index
    %49 = vector.load %arg7[%c0_19, %c0_20] : memref<1152x128xbf16, #tpu.memory_space<vmem>>, vector<1152x128xbf16>
    %cst_21 = arith.constant dense<0.000000e+00> : vector<128x128xf32>
    %50 = tpu.matmul %48, %49, %cst_21 {dimension_numbers = #tpu.dot_dimension_numbers<[1], [0], [0], [1], [0, 0, 1, 1], [], []>} : vector<128x1152xbf16>, vector<1152x128xbf16>, vector<128x128xf32> -> vector<128x128xf32>
    %c0_22 = arith.constant 0 : index
    %c0_23 = arith.constant 0 : index
    %51 = vector.load %arg8[%c0_22, %c0_23] : memref<1x128xf32, #tpu.memory_space<vmem>>, vector<1x128xf32>
    %52 = vector.broadcast %51 : vector<1x128xf32> to vector<128x128xf32>
    %53 = arith.addf %50, %52 : vector<128x128xf32>
    %cst_24 = arith.constant 0.000000e+00 : f32
    %cst_25 = arith.constant 6.000000e+00 : f32
    %54 = vector.broadcast %cst_24 : f32 to vector<128x128xf32>
    %55 = arith.maximumf %54, %53 : vector<128x128xf32>
    %56 = vector.broadcast %cst_25 : f32 to vector<128x128xf32>
    %57 = arith.minimumf %56, %55 : vector<128x128xf32>
    %58 = arith.addf %57, %2 : vector<128x128xf32>
    %59 = vector.shape_cast %58 : vector<128x128xf32> to vector<8x16x128xf32>
    %c0_26 = arith.constant 0 : index
    %c0_27 = arith.constant 0 : index
    %c0_28 = arith.constant 0 : index
    %c0_29 = arith.constant 0 : index
    %60 = vector.load %arg9[%c0_26, %c0_27, %c0_28, %c0_29] : memref<1x8x16x128xf32, #tpu.memory_space<vmem>>, vector<1x8x16x128xf32>
    %61 = vector.shape_cast %60 : vector<1x8x16x128xf32> to vector<8x16x128xf32>
    %62 = vector.shape_cast %59 : vector<8x16x128xf32> to vector<1x8x16x128xf32>
    tpu.vector_store %arg9[%c0_26, %c0_27, %c0_28, %c0_29], %62 {strides = array<i32>} : memref<1x8x16x128xf32, #tpu.memory_space<vmem>>, vector<1x8x16x128xf32>,
    return
  }
  func.func @transform_0(%arg0: i32, %arg1: i32) -> (i32, i32, i32, i32) {
    %c0_i32 = arith.constant 0 : i32
    %c0_i32_0 = arith.constant 0 : i32
    %c0_i32_1 = arith.constant 0 : i32
    return %arg0, %arg1, %c0_i32, %c0_i32_0 : i32, i32, i32, i32
  }
  func.func @transform_1(%arg0: i32, %arg1: i32) -> (i32, i32, i32, i32) {
    %c0_i32 = arith.constant 0 : i32
    %c0_i32_0 = arith.constant 0 : i32
    %c0_i32_1 = arith.constant 0 : i32
    return %arg0, %arg1, %c0_i32, %c0_i32_0 : i32, i32, i32, i32
  }
  func.func @transform_2(%arg0: i32, %arg1: i32) -> (i32, i32, i32, i32) {
    %c0_i32 = arith.constant 0 : i32
    %c0_i32_0 = arith.constant 0 : i32
    %c0_i32_1 = arith.constant 0 : i32
    return %arg0, %arg1, %c0_i32, %c0_i32_0 : i32, i32, i32, i32
  }
  func.func @transform_3(%arg0: i32, %arg1: i32) -> (i32, i32) {
    %c0_i32 = arith.constant 0 : i32
    %c0_i32_0 = arith.constant 0 : i32
    %c0_i32_1 = arith.constant 0 : i32
    return %c0_i32, %c0_i32_0 : i32, i32
  }
  func.func @transform_4(%arg0: i32, %arg1: i32) -> (i32, i32) {
    %c0_i32 = arith.constant 0 : i32
    %c0_i32_0 = arith.constant 0 : i32
    %c0_i32_1 = arith.constant 0 : i32
    return %c0_i32, %c0_i32_0 : i32, i32
  }
  func.func @transform_5(%arg0: i32, %arg1: i32) -> (i32, i32) {
    %c0_i32 = arith.constant 0 : i32
    %c0_i32_0 = arith.constant 0 : i32
    %c0_i32_1 = arith.constant 0 : i32
    return %c0_i32, %c0_i32_0 : i32, i32
  }
  func.func @transform_6(%arg0: i32, %arg1: i32) -> (i32, i32) {
    %c0_i32 = arith.constant 0 : i32
    %c0_i32_0 = arith.constant 0 : i32
    %c0_i32_1 = arith.constant 0 : i32
    return %c0_i32, %c0_i32_0 : i32, i32
  }
  func.func @transform_7(%arg0: i32, %arg1: i32) -> (i32, i32, i32, i32) {
    %c0_i32 = arith.constant 0 : i32
    %c0_i32_0 = arith.constant 0 : i32
    %c0_i32_1 = arith.constant 0 : i32
    return %arg0, %arg1, %c0_i32, %c0_i32_0 : i32, i32, i32, i32
  }
}

</mosaic_0001>

<bundles_post_ra>
// kernel: residual_forward_nhwc.1
= control target key start
LH: loop header
LB: loop body
LE: loop exit
PB: predicated region body
PF: predicated region fallthrough
CT: control target
= control target key end

     0   :  { %s3086_s24 = smov 0   ;;  %s3088_s25 = smov 0   ;;  %s3912_s0 = inlined_call_operand.vmem [shape: f32[2,16,16,128], index: 0, kind: input, shape index: {}, may-alias: {0,7}]   ;;  %s3913_s1 = inlined_call_operand.vmem [shape: f32[2,2,16,128], index: 1, kind: input, shape index: {}]   ;;  %s3914_s2 = inlined_call_operand.vmem [shape: f32[2,2,16,128], index: 2, kind: input, shape index: {}]   ;;  %s3915_s3 = inlined_call_operand.vmem [shape: bf16[128,128], index: 3, kind: input, shape index: {}]   ;;  %s3916_s4 = inlined_call_operand.vmem [shape: f32[1,128], index: 4, kind: input, shape index: {}]   ;;  %s3917_s5 = inlined_call_operand.vmem [shape: bf16[1152,128], index: 5, kind: input, shape index: {}]   ;;  %s3918_s6 = inlined_call_operand.vmem [shape: f32[1,128], index: 6, kind: input, shape index: {}]   ;;  %s3919_s7 = inlined_call_operand.vmem [shape: f32[2,16,16,128], index: 7, kind: output, shape index: {}, may-alias: {0,7}]  }
   0x1   :  { %s3090_s26 = smov 0   ;;  %s3092_s27 = smov 0  }
   0x2   :  { %s3094_s28 = smov 0  }
   0x3 LB: > { %s26_s29 = sadd.s32 1, %s3036_s26  ;;  %s29_s30 = sadd.s32 1, %s3040_s27  ;;  %s3044_s28 = sphi %s3094_s28, %s17_s28   ;;  %s3040_s27 = sphi %s3092_s27, %s3927_s27   ;;  %s3036_s26 = sphi %s3090_s26, %s3926_s26   ;;  %s3032_s25 = sphi %s3088_s25, %s3925_s25   ;;  %s3028_s24 = sphi %s3086_s24, %s3924_s24  }
   0x4   : > { %p27_p0 = scmp.ge.s32.totalorder %s26_s29, 2  ;;  %p2427_p1 = scmp.ge.s32.totalorder %s3044_s28, 1 }
   0x5   : > { %p291_p2 = scmp.lt.s32.totalorder %s3044_s28, 5 }
   0x6   : > { %s3929_s29 = smov (%p27_p0, %s26_s29), 0  ;;  %s3931_s30 = smov (!%p27_p0, %s29_s30), %s3040_s27 }
   0x7   : > { %p292_p3 = pnand %p2427_p1, %p291_p2  ;;  %p31_p4 = scmp.ge.s32.totalorder %s3931_s30, 2 }
   0x8   : > { %v2924_v0 = vld [vmem:[%s3915_s3] sm:$0xff] (!%p292_p3)   ;;  %s2428_s10 = sshll.u32 (!%p292_p3), %s3028_s24, 3  ;;  %v2925_v1 = vld [vmem:[%s3915_s3 + $0x8] sm:$0xff] (!%p292_p3)   ;;  %p352_p5 = scmp.lt.s32.totalorder (!%p292_p3), %s3032_s25, 1  ;;  %v2926_v2 = vld [vmem:[%s3915_s3 + $0x10] sm:$0xff] (!%p292_p3)   ;;  %vm935_vm1 = vcmask (!%p292_p3), 1040384  }
   0x9   : > { %s3933_s30 = smov (%p31_p4, %s3931_s30), 0  ;;  %295 = sbr.rel (%p292_p3) target bundleno = 658 (0x292), region = 48 }
   0xa   : > { %2816 = vmatprep.subr.bf16.mxu0 (!%p292_p3), %v2924_v0  ;;  %p354_p6 = scmp.lt.s32.totalorder (!%p292_p3), %s2428_s10, 15  ;;  %p364_p7 = scmp.lt.s32.totalorder (!%p292_p3), %s3028_s24, 1  ;;  %v2927_v3 = vld [vmem:[%s3915_s3 + $0x18] sm:$0xff] (!%p292_p3)   ;;  %v2928_v4 = vld [vmem:[%s3915_s3 + $0x20] sm:$0xff] (!%p292_p3)   ;;  %v2929_v5 = vld [vmem:[%s3915_s3 + $0x28] sm:$0xff] (!%p292_p3)   ;;  %vm1079_vm4 = vcmask (!%p292_p3), 1046528  }
   0xb   : > { %2817 = vmatpush3.bf16.msra.mxu0 (!%p292_p3), %v2924_v0  ;;  %v2934_v9 = vld [vmem:[%s3917_s5 + $0x40] sm:$0xff] (!%p292_p3)   ;;  %v2930_v11 = vld [vmem:[%s3915_s3 + $0x30] sm:$0xff] (!%p292_p3)   ;;  %v2938_v12 = vld [vmem:[%s3917_s5 + $0x48] sm:$0xff] (!%p292_p3)   ;;  %p687_p8 = scmp.gt.s32.totalorder (!%p292_p3), %s3028_s24, 0  ;;  %vm936_vm2 = vsmask.f32 (!%p292_p3), 256 }
   0xc   : > { %2818 = vmatprep.subr.bf16.mxu0 (!%p292_p3), %v2925_v1  ;;  %v2936_v10 = vld [vmem:[%s3917_s5] sm:$0xff] (!%p292_p3)   ;;  %2544 = vmatprep.subr.bf16.mxu1 (!%p292_p3), %v2934_v9  ;;  %v2931_v13 = vld [vmem:[%s3915_s3 + $0x38] sm:$0xff] (!%p292_p3)   ;;  %v2935_v21 = vld [vmem:[%s3917_s5 + $0xc8] sm:$0xff] (!%p292_p3)   ;;  %vm958_vm5 = vsmask.f32 (!%p292_p3), 7424 }
   0xd   : > { %2545 = vmatpush3.bf16.msra.mxu1 (!%p292_p3), %v2936_v10  ;;  %v2932_v18 = vld [vmem:[%s3917_s5 + $0xc0] sm:$0xff] (!%p292_p3)   ;;  %v2937_v25 = vld [vmem:[%s3917_s5 + $0x88] sm:$0xff] (!%p292_p3)   ;;  %v2939_v28 = vld [vmem:[%s3917_s5 + $0xd0] sm:$0xff] (!%p292_p3)  }
   0xe   : > { %2546 = vmatprep.subr.bf16.mxu1 (!%p292_p3), %v2938_v12  ;;  %v2933_v19 = vld [vmem:[%s3917_s5 + $0x80] sm:$0xff] (!%p292_p3)   ;;  %v2941_v46 = vld [vmem:[%s3917_s5 + $0x90] sm:$0xff] (!%p292_p3)   ;;  %v2940_v47 = vld [vmem:[%s3917_s5 + $0x8] sm:$0xff] (!%p292_p3)  }
   0xf   : > { %2819 = vmatpush3.bf16.msra.mxu0 (!%p292_p3), %v2925_v1  ;;  %v2943_v48 = vld [vmem:[%s3917_s5 + $0xd8] sm:$0xff] (!%p292_p3)   ;;  %v2942_v49 = vld [vmem:[%s3917_s5 + $0x50] sm:$0xff] (!%p292_p3)   ;;  %v2947_v52 = vld [vmem:[%s3917_s5 + $0xe0] sm:$0xff] (!%p292_p3)  }
  0x10   : > { %s3935_s25 = smov (!%p352_p5, %s3032_s25), 1  ;;  %2820 = vmatprep.subr.bf16.mxu0 %v2926_v2  ;;  %s3937_s10 = smov (!%p354_p6, %s2428_s10), 15  ;;  %v2945_v50 = vld [vmem:[%s3917_s5 + $0x98] sm:$0xff]   ;;  %v2944_v51 = vld [vmem:[%s3917_s5 + $0x10] sm:$0xff]   ;;  %v2949_v54 = vld [vmem:[%s3917_s5 + $0xa0] sm:$0xff]  }
  0x11   : > { %s2433_s17 = sshll.u32 %s3935_s25, 2  ;;  %s2430_s21 = sshll.u32 %s3935_s25, 5  ;;  %2547 = vmatpush3.bf16.msra.mxu1 %v2940_v47  ;;  %v2946_v53 = vld [vmem:[%s3917_s5 + $0x58] sm:$0xff]   ;;  %v2951_v56 = vld [vmem:[%s3917_s5 + $0xe8] sm:$0xff]   ;;  %v2950_v57 = vld [vmem:[%s3917_s5 + $0x60] sm:$0xff]  }
  0x12   : > { %s365_s18 = scalar_select %p364_p7, %s3028_s24, 1  ;;  %2548 = vmatprep.subr.bf16.mxu1 %v2942_v49  ;;  %v2948_v55 = vld [vmem:[%s3917_s5 + $0x18] sm:$0xff]   ;;  %v2953_v58 = vld [vmem:[%s3917_s5 + $0xa8] sm:$0xff]   ;;  %v2952_v59 = vld [vmem:[%s3917_s5 + $0x20] sm:$0xff]  }
  0x13   : > { %2821 = vmatpush3.bf16.msra.mxu0 %v2926_v2  ;;  %s2429_s23 = sshll.u32 %s3937_s10, 1  ;;  %v2955_v60 = vld [vmem:[%s3917_s5 + $0xf0] sm:$0xff]   ;;  %v2954_v61 = vld [vmem:[%s3917_s5 + $0x68] sm:$0xff]   ;;  %v2959_v0 = vld [vmem:[%s3917_s5 + $0xf8] sm:$0xff]  }
  0x14   : > { %2822 = vmatprep.subr.bf16.mxu0 %v2927_v3  ;;  %s2432_s22 = sshll.u32 %s365_s18, 1  ;;  %s3149_s16 = sadd.s32 %s2430_s21, %s2429_s23  ;;  %v2957_v62 = vld [vmem:[%s3917_s5 + $0xb0] sm:$0xff]   ;;  %v2956_v63 = vld [vmem:[%s3917_s5 + $0x28] sm:$0xff]   ;;  %v2961_v2 = vld [vmem:[%s3917_s5 + $0xb8] sm:$0xff]  }
  0x15   : > { %s3138_s8 = sadd.s32 %s2433_s17, %s2432_s22  ;;  %s2431_s17 = sshll.u32 %s3149_s16, 3  ;;  %2549 = vmatpush3.bf16.msra.mxu1 %v2944_v51  ;;  %v2958_v1 = vld [vmem:[%s3917_s5 + $0x70] sm:$0xff]   ;;  %vm3345_vm3 = vmand %vm935_vm1, %vm936_vm2 }
  0x16   : > { %s2434_s9 = sshll.u32 %s3138_s8, 3  ;;  %s3172_s15 = scalar_lea.vmem %s3912_s0, %s2431_s17  ;;  %2550 = vmatprep.subr.bf16.mxu1 %v2946_v53 }
  0x17   : > { %2823 = vmatpush3.bf16.msra.mxu0 %v2927_v3  ;;  %s370_s13 = scalar_lea.vmem %s3913_s1, %s2434_s9  ;;  %v392_v14 = vld [vmem:[%s3172_s15] sm:$0xff]  ;;  %v3176_v15 = vld [vmem:[%s3172_s15 + $0x8] sm:$0xff]  ;;  %v394_v16 = vld [vmem:[%s3172_s15 + $0x10] sm:$0xff]  ;;  %s379_s25 = scalar_lea.vmem %s3914_s2, %s2434_s9 }
  0x18   : > { %2824 = vmatprep.subr.bf16.mxu0 %v2928_v4  ;;  %v408_v6 = vld [vmem:[%s370_s13] sm:$0xff]  ;;  %v409_v7 = vld [vmem:[%s370_s13 + $0x8] sm:$0xff]  ;;  %v3180_v17 = vld [vmem:[%s3172_s15 + $0x18] sm:$0xff]  ;;  %v413_v20 = vpack.c.bf16 %v3176_v15, %v392_v14  ;;  %s688_s14 = scalar_select %p687_p8, 1, 0 }
  0x19   : > { %v412_v8 = vpack.c.bf16 %v409_v7, %v408_v6  ;;  %v414_v22 = vpack.c.bf16 %v3180_v17, %v394_v16  ;;  %v3194_v23 = vld [vmem:[%s3172_s15 + $0x20] sm:$0xff]  ;;  %v3197_v24 = vld [vmem:[%s3172_s15 + $0x28] sm:$0xff]  ;;  %v3203_v26 = vld [vmem:[%s3172_s15 + $0x30] sm:$0xff]  ;;  %2551 = vmatpush3.bf16.msra.mxu1 %v2948_v55  ;;  %s3458_s11 = scalar_select %p364_p7, 1, 0 }
  0x1a   : > { %v3206_v27 = vld [vmem:[%s3172_s15 + $0x38] sm:$0xff]  ;;  %v415_v29 = vpack.c.bf16 %v3197_v24, %v3194_v23  ;;  %v3216_v31 = vld [vmem:[%s3172_s15 + $0x40] sm:$0xff]  ;;  %v3219_v32 = vld [vmem:[%s3172_s15 + $0x48] sm:$0xff]  ;;  %2552 = vmatprep.subr.bf16.mxu1 %v2950_v57  ;;  %s3851_s21 = scalar_lea.vmem %s3919_s7, %s2431_s17 }
  0x1b   : > { %2825 = vmatpush3.bf16.msra.mxu0 %v2928_v4  ;;  %2832 = vmatprep.mubr.bf16.mxu0 %v412_v8  ;;  %v416_v30 = vpack.c.bf16 %v3206_v27, %v3203_v26  ;;  %v3222_v33 = vld [vmem:[%s3172_s15 + $0x50] sm:$0xff]  ;;  %v3225_v34 = vld [vmem:[%s3172_s15 + $0x58] sm:$0xff]  ;;  %v417_v35 = vpack.c.bf16 %v3219_v32, %v3216_v31  ;;  %v3232_v37 = vld [vmem:[%s3172_s15 + $0x60] sm:$0xff] }
  0x1c   : > { %2826 = vmatprep.subr.bf16.mxu0 %v2929_v5  ;;  %v418_v36 = vpack.c.bf16 %v3225_v34, %v3222_v33  ;;  %v3235_v38 = vld [vmem:[%s3172_s15 + $0x68] sm:$0xff]  ;;  %v3238_v39 = vld [vmem:[%s3172_s15 + $0x70] sm:$0xff]  ;;  %v3241_v40 = vld [vmem:[%s3172_s15 + $0x78] sm:$0xff] }
  0x1d   : > { %v419_v41 = vpack.c.bf16 %v3235_v38, %v3232_v37  ;;  %v420_v42 = vpack.c.bf16 %v3241_v40, %v3238_v39  ;;  %v410_v43 = vld [vmem:[%s379_s25] sm:$0xff]  ;;  %v411_v44 = vld [vmem:[%s379_s25 + $0x8] sm:$0xff]  ;;  %2553 = vmatpush3.bf16.msra.mxu1 %v2952_v59  ;;  %v2960_v3 = vld [vmem:[%s3917_s5 + $0x30] sm:$0xff]  }
  0x1e   : > { %v421_v45 = vpack.c.bf16 %v411_v44, %v410_v43  ;;  %2554 = vmatprep.subr.bf16.mxu1 %v2954_v61  ;;  %v2962_v4 = vld [vmem:[%s3917_s5 + $0x78] sm:$0xff]   ;;  %v2964_v6 = vld [vmem:[%s3917_s5 + $0x140] sm:$0xff]  }
  0x1f   : > { %2827 = vmatpush3.bf16.msra.mxu0 %v2929_v5  ;;  %v2963_v5 = vld [vmem:[%s3917_s5 + $0x38] sm:$0xff]   ;;  %v2972_v7 = vld [vmem:[%s3917_s5 + $0x1c0] sm:$0xff]  }
  0x20   : > { %2828 = vmatprep.subr.bf16.mxu0 %v2930_v11  ;;  %v3334_v8 = vld [vmem:[%s3916_s4] ss:$0 sm:$0xff] }
  0x21   : > { %2555 = vmatpush3.bf16.msra.mxu1 %v2956_v63 }
  0x22   : > { %2556 = vmatprep.subr.bf16.mxu1 %v2958_v1 }
  0x23   : > { %2829 = vmatpush3.bf16.msra.mxu0 %v2930_v11 }
  0x24   : > { %2830 = vmatprep.subr.bf16.mxu0 %v2931_v13 }
  0x25   : > { %2557 = vmatpush3.bf16.msra.mxu1 %v2960_v3 }
  0x26   : > { %2558 = vmatprep.subr.bf16.mxu1 %v2962_v4 }
  0x27   : > { %2831 = vmatpush3.bf16.msra.mxu0 %v2931_v13 }
  0x28   : > { %2608 = vmatprep.subr.bf16.mxu0 %v2932_v18 }
  0x29   : > { %2559 = vmatpush3.bf16.msra.mxu1 %v2963_v5 }
  0x2a   : > { %2833 = vmatmul.mubr.bf16.vlgmr.msra.gmra.mrb[0].mxu0 %v413_v20  ;;  %2672 = vmatprep.subr.bf16.mxu1 %v2964_v6  ;;  %v689_v20 = vstv %s688_s14 }
  0x2b   : > { %2836 = vmatprep.mubr.bf16.mxu0 %v414_v22  ;;  %2609 = vmatpush3.bf16.msra.mxu0 %v2933_v19  ;;  %vm690_vm0 = vcmp.eq.s32.totalorder %v689_v20, 1 }
  0x2c   : > { %2610 = vmatprep.subr.bf16.mxu0 %v2935_v21 }
  0x2f   : > { %2611 = vmatpush3.bf16.msra.mxu0 %v2937_v25 }
  0x30   : > { %2612 = vmatprep.subr.bf16.mxu0 %v2939_v28 }
  0x32   : > { %2837 = vmatmul.mubr.bf16.gmra.mrb[4].mxu0 %v415_v29 }
  0x33   : > { %2840 = vmatprep.mubr.bf16.mxu0 %v416_v30  ;;  %2613 = vmatpush3.bf16.msra.mxu0 %v2941_v46 }
  0x34   : > { %2614 = vmatprep.subr.bf16.mxu0 %v2943_v48 }
  0x37   : > { %2615 = vmatpush3.bf16.msra.mxu0 %v2945_v50 }
  0x38   : > { %2616 = vmatprep.subr.bf16.mxu0 %v2947_v52 }
  0x3a   : > { %2841 = vmatmul.mubr.bf16.gmra.mrb[8].mxu0 %v417_v35 }
  0x3b   : > { %2844 = vmatprep.mubr.bf16.mxu0 %v418_v36  ;;  %2617 = vmatpush3.bf16.msra.mxu0 %v2949_v54 }
  0x3c   : > { %2618 = vmatprep.subr.bf16.mxu0 %v2951_v56 }
  0x3f   : > { %2619 = vmatpush3.bf16.msra.mxu0 %v2953_v58 }
  0x40   : > { %2620 = vmatprep.subr.bf16.mxu0 %v2955_v60 }
  0x42   : > { %2845 = vmatmul.mubr.bf16.gmra.mrb[12].mxu0 %v419_v41 }
  0x43   : > { %2848 = vmatprep.mubr.bf16.mxu0 %v420_v42  ;;  %2621 = vmatpush3.bf16.msra.mxu0 %v2957_v62 }
  0x44   : > { %2622 = vmatprep.subr.bf16.mxu0 %v2959_v0 }
  0x47   : > { %2623 = vmatpush3.bf16.msra.mxu0 %v2961_v2 }
  0x48   : > { %2736 = vmatprep.subr.bf16.mxu0 %v2972_v7 }
  0x4a   : > { %2849 = vmatmul.mubr.bf16.gmra.mrb[16].mxu0 %v421_v45 }
  0xfd   : > { %v2834_v9 = vpop.f32.mrb[0].mxu0 }
  0xfe   : > { %v536_v10 = vadd.f32 %v2834_v9, %v3334_v8  ;;  %v527_v11 = vpop.f32.mrb[1].mxu0 }
  0xff   : > { %v528_v12 = vadd.f32 %v3334_v8, %v527_v11  ;;  %v2835_v13 = vpop.f32.mrb[2].mxu0 }
 0x100   : > { %v608_v14 = vmax.f32 %v536_v10, 0.0  ;;  %v539_v16 = vadd.f32 %v2835_v13, %v3334_v8  ;;  %v530_v18 = vpop.f32.mrb[3].mxu0 }
 0x101   : > { %v606_v19 = vmax.f32 %v528_v12, 0.0  ;;  %v531_v21 = vadd.f32 %v3334_v8, %v530_v18 }
 0x102   : > { %v609_v22 = vmax.f32 %v539_v16, 0.0  ;;  %v628_v29 = vmin.f32 %v608_v14, 6.0 }
 0x103   : > { %v626_v25 = vmin.f32 %v606_v19, 6.0  ;;  %v607_v28 = vmax.f32 %v531_v21, 0.0 }
 0x104   : > { %v629_v30 = vmin.f32 %v609_v22, 6.0 }
 0x105   : > { %v627_v35 = vmin.f32 %v607_v28, 6.0  ;;  %v2838_v36 = vpop.f32.mrb[4].mxu0  ;;  %v815_v44 = vsel %vm690_vm0, %v626_v25, 0.0 }
 0x106   : > { %v836_v41 = vpack.c.bf16 %v629_v30, %v628_v29  ;;  %v552_v42 = vadd.f32 %v2838_v36, %v3334_v8  ;;  %v543_v43 = vpop.f32.mrb[5].mxu0 }
 0x107   : > { %v816_v45 = vsel %vm690_vm0, %v627_v35, 0.0  ;;  %v544_v46 = vadd.f32 %v3334_v8, %v543_v43  ;;  %v2839_v47 = vpop.f32.mrb[6].mxu0  ;;  %v2973_v43 = vld [vmem:[%s3917_s5 + $0x180] sm:$0xff]  }
 0x108   : > { %v853_v48 = vshrl.u32 %v836_v41, 16  ;;  %v835_v49 = vpack.c.bf16 %v816_v45, %v815_v44  ;;  %v612_v50 = vmax.f32 %v552_v42, 0.0  ;;  %v546_v51 = vpop.f32.mrb[7].mxu0  ;;  %v555_v53 = vadd.f32 %v2839_v47, %v3334_v8 }
 0x109   : > { %v610_v52 = vmax.f32 %v544_v46, 0.0  ;;  %v547_v54 = vadd.f32 %v3334_v8, %v546_v51  ;;  %v856_v56 = vshll.u32 %v836_v41, 16 }
 0x10a   : > { %v855_v55 = vrot.slane %v853_v48, 7  ;;  %v846_v57 = vshrl.u32 %v835_v49, 16  ;;  %v632_v59 = vmin.f32 %v612_v50, 6.0  ;;  %v613_v61 = vmax.f32 %v555_v53, 0.0  ;;  %v2975_v48 = vld [vmem:[%s3917_s5 + $0x1c8] sm:$0xff]  }
 0x10b   : > { %v630_v60 = vmin.f32 %v610_v52, 6.0  ;;  %v611_v62 = vmax.f32 %v547_v54, 0.0  ;;  %v849_v1 = vshll.u32 %v835_v49, 16 }
 0x10c   : > { %v858_v63 = vor.u32 %v856_v56, %v855_v55  ;;  %v848_v0 = vrot.slane %v846_v57, 7  ;;  %v633_v2 = vmin.f32 %v613_v61, 6.0  ;;  %v3351_v5 = vsel %vm3345_vm3, %v855_v55, 0 }
 0x10d   : > { %v631_v3 = vmin.f32 %v611_v62, 6.0  ;;  %v2842_v4 = vpop.f32.mrb[8].mxu0  ;;  %v979_v22 = vshll.u32 %v3351_v5, 16 }
 0x10e   : > { %v851_v6 = vor.u32 %v849_v1, %v848_v0  ;;  %v948_v7 = vsel %vm3345_vm3, %v848_v0, 0  ;;  %v3357_v9 = vsel %vm3345_vm3, 0, %v858_v63  ;;  %v568_v10 = vadd.f32 %v2842_v4, %v3334_v8  ;;  %v559_v11 = vpop.f32.mrb[9].mxu0  ;;  %v2977_v0 = vld [vmem:[%s3917_s5 + $0x188] sm:$0xff]  }
 0x10f   : > { %v838_v12 = vpack.c.bf16 %v633_v2, %v632_v59  ;;  %v837_v13 = vpack.c.bf16 %v631_v3, %v630_v60  ;;  %1862 = vmatprep.mubr.bf16.mxu0 %v3357_v9  ;;  %v560_v14 = vadd.f32 %v3334_v8, %v559_v11  ;;  %v2843_v16 = vpop.f32.mrb[10].mxu0  ;;  %v967_v30 = vshll.u32 %v948_v7, 16  ;;  %v2965_v11 = vld [vmem:[%s3917_s5 + $0x100] sm:$0xff]  }
 0x110   : > { %v938_v18 = vsel %vm3345_vm3, 0, %v851_v6  ;;  %v616_v19 = vmax.f32 %v568_v10, 0.0  ;;  %v571_v20 = vadd.f32 %v2843_v16, %v3334_v8  ;;  %v562_v21 = vpop.f32.mrb[11].mxu0  ;;  %v1081_v35 = vrot.slane %v948_v7, 1  ;;  %v2978_v7 = vld [vmem:[%s3917_s5 + $0x1d0] sm:$0xff]  }
 0x111   : > { %v867_v25 = vshrl.u32 %v838_v12, 16  ;;  %v860_v28 = vshrl.u32 %v837_v13, 16  ;;  %v863_v29 = vshll.u32 %v837_v13, 16  ;;  %v870_v36 = vshll.u32 %v838_v12, 16 }
 0x112   : > { %v1080_v41 = vrot.slane %v938_v18, 1  ;;  %v614_v42 = vmax.f32 %v560_v14, 0.0  ;;  %v636_v46 = vmin.f32 %v616_v19, 6.0  ;;  %v962_v47 = vshll.u32 %v938_v18, 16 }
 0x113   : > { %v3369_v44 = vrot.slane %v867_v25, 7  ;;  %v862_v45 = vrot.slane %v860_v28, 7  ;;  %v960_v50 = vshrl.u32 %v938_v18, 16  ;;  %v617_v51 = vmax.f32 %v571_v20, 0.0 }
 0x114   : > { %v1082_v49 = vsel %vm1079_vm4, %v1080_v41, %v1081_v35  ;;  %v563_v52 = vadd.f32 %v3334_v8, %v562_v21  ;;  %v634_v54 = vmin.f32 %v614_v42, 6.0  ;;  %v964_v55 = vrot.slane %v962_v47, 1  ;;  %v2966_v35 = vld [vmem:[%s3917_s5 + $0x148] sm:$0xff]   ;;  %v2981_v47 = vld [vmem:[%s3917_s5 + $0x1d8] sm:$0xff]  }
 0x115   : > { %v865_v53 = vor.u32 %v863_v29, %v862_v45  ;;  %1863 = vmatmul.mubr.bf16.vlgmr.msra.gmra.mrb[20].mxu0 %v1082_v49  ;;  %v969_v56 = vrot.slane %v967_v30, 1  ;;  %v2846_v57 = vpop.f32.mrb[12].mxu0  ;;  %v872_v59 = vor.u32 %v870_v36, %v3369_v44  ;;  %v637_v60 = vmin.f32 %v617_v51, 6.0 }
 0x116   : > { %v615_v61 = vmax.f32 %v563_v52, 0.0  ;;  %v974_v62 = vshll.u32 %v3357_v9, 16  ;;  %v575_v63 = vpop.f32.mrb[13].mxu0  ;;  %2737 = vmatpush3.bf16.msra.mxu0 %v2973_v43  ;;  %v965_v1 = vor.u32 %v964_v55, %v960_v50  ;;  %v972_v2 = vshrl.u32 %v3357_v9, 16  ;;  %v2968_v52 = vld [vmem:[%s3917_s5 + $0x150] sm:$0xff]  }
 0x117   : > { %v3384_v3 = vsel %vm3345_vm3, 0, %v865_v53  ;;  %v1083_v4 = vrot.slane %v3357_v9, 1  ;;  %v2847_v6 = vpop.f32.mrb[14].mxu0  ;;  %2738 = vmatprep.subr.bf16.mxu0 %v2975_v48  ;;  %v3390_v10 = vpack.c.bf16 %v637_v60, %v636_v46  ;;  %v3398_v14 = vsel %vm3345_vm3, %v862_v45, 0  ;;  %v2967_v46 = vld [vmem:[%s3917_s5 + $0x108] sm:$0xff]  }
 0x118   : > { %v635_v12 = vmin.f32 %v615_v61, 6.0  ;;  %v976_v13 = vrot.slane %v974_v62, 1  ;;  %1870 = vmatprep.mubr.bf16.mxu0 %v3384_v3  ;;  %v578_v16 = vpop.f32.mrb[15].mxu0  ;;  %v970_v19 = vsel %vm958_vm5, %v965_v1, %v969_v56  ;;  %v984_v20 = vshrl.u32 %v3384_v3, 16 }
 0x119   : > { %v986_v21 = vshll.u32 %v3384_v3, 16  ;;  %1765 = vmatprep.mubr.bf16.mxu1 %v970_v19  ;;  %v981_v29 = vrot.slane %v979_v22, 1  ;;  %v1084_v30 = vrot.slane %v3351_v5, 1  ;;  %v3409_v36 = vsel %vm3345_vm3, 0, %v872_v59  ;;  %v2979_v22 = vld [vmem:[%s3917_s5 + $0x190] sm:$0xff]   ;;  %v2970_v19 = vld [vmem:[%s3917_s5 + $0x158] sm:$0xff]  }
 0x11a   : > { %v839_v25 = vpack.c.bf16 %v635_v12, %v634_v54  ;;  %v977_v28 = vor.u32 %v976_v13, %v972_v2  ;;  %2739 = vmatpush3.bf16.msra.mxu0 %v2977_v0  ;;  %1766 = vmatmul.mubr.bf16.vlgmr.msra.gmra.mrb[0].mxu1 %v938_v18  ;;  %v991_v42 = vshll.u32 %v3398_v14, 16  ;;  %v881_v48 = vshrl.u32 %v3390_v10, 16  ;;  %v2969_v0 = vld [vmem:[%s3917_s5 + $0x110] sm:$0xff]  }
 0x11b   : > { %v988_v41 = vrot.slane %v986_v21, 1  ;;  %2740 = vmatprep.subr.bf16.mxu0 %v2978_v7  ;;  %2673 = vmatpush3.bf16.msra.mxu1 %v2965_v11  ;;  %v3419_v18 = vsel %vm1079_vm4, %v1083_v4, %v1084_v30  ;;  %v584_v51 = vadd.f32 %v2846_v57, %v3334_v8  ;;  %v884_v54 = vshll.u32 %v3390_v10, 16 }
 0x11c   : > { %v874_v5 = vshrl.u32 %v839_v25, 16  ;;  %v877_v43 = vshll.u32 %v839_v25, 16  ;;  %v3416_v45 = vsel %vm958_vm5, %v977_v28, %v981_v29  ;;  %v993_v50 = vrot.slane %v991_v42, 1  ;;  %2674 = vmatprep.subr.bf16.mxu1 %v2966_v35  ;;  %v2984_v28 = vld [vmem:[%s3917_s5 + $0x1e0] sm:$0xff]  }
 0x11d   : > { %1773 = vmatprep.mubr.bf16.mxu1 %v3416_v45  ;;  %1871 = vmatmul.mubr.bf16.gmra.mrb[24].mxu0 %v3419_v18  ;;  %v989_v49 = vor.u32 %v988_v41, %v984_v20  ;;  %v3434_v53 = vpop.f32.mrb[16].mxu0  ;;  %v576_v56 = vadd.f32 %v3334_v8, %v575_v63  ;;  %v587_v59 = vadd.f32 %v2847_v6, %v3334_v8  ;;  %v1086_v57 = vrot.slane %v3384_v3, 1  ;;  %v2983_v63 = vld [vmem:[%s3917_s5 + $0x198] sm:$0xff]   ;;  %v2985_v42 = vld [vmem:[%s3917_s5 + $0x1a0] sm:$0xff]  }
 0x11e   : > { %v876_v55 = vrot.slane %v874_v5, 7  ;;  %1878 = vmatprep.mubr.bf16.mxu0 %v3409_v36  ;;  %v3440_v60 = vpop.f32.mrb[17].mxu0  ;;  %v1087_v61 = vrot.slane %v3398_v14, 1  ;;  %v620_v62 = vmax.f32 %v584_v51, 0.0  ;;  %v579_v1 = vadd.f32 %v3334_v8, %v578_v16  ;;  %2741 = vmatpush3.bf16.msra.mxu0 %v2979_v22 }
 0x11f   : > { %v2851_v2 = vpop.f32.mrb[18].mxu0  ;;  %2675 = vmatpush3.bf16.msra.mxu1 %v2967_v46  ;;  %v618_v6 = vmax.f32 %v576_v56, 0.0  ;;  %v621_v7 = vmax.f32 %v587_v59, 0.0  ;;  %v3454_v10 = vsel %vm3345_vm3, %v3369_v44, 0  ;;  %2742 = vmatprep.subr.bf16.mxu0 %v2981_v47  ;;  %v3463_v12 = vsel %vm958_vm5, %v989_v49, %v993_v50  ;;  %v2987_v46 = vld [vmem:[%s3917_s5 + $0x1e8] sm:$0xff]   ;;  %v2974_v49 = vld [vmem:[%s3917_s5 + $0x160] sm:$0xff]  }
 0x120   : > { %v879_v4 = vor.u32 %v877_v43, %v876_v55  ;;  %v3460_v11 = vpop.f32.mrb[19].mxu0  ;;  %v640_v13 = vmin.f32 %v620_v62, 6.0  ;;  %2676 = vmatprep.subr.bf16.mxu1 %v2968_v52  ;;  %v619_v14 = vmax.f32 %v579_v1, 0.0  ;;  %v998_v16 = vshll.u32 %v3409_v36, 16  ;;  %v2976_v1 = vld [vmem:[%s3917_s5 + $0x120] sm:$0xff]  }
 0x121   : > { %v3469_v44 = vrot.slane %v881_v48, 7  ;;  %v638_v20 = vmin.f32 %v618_v6, 6.0  ;;  %v641_v21 = vmin.f32 %v621_v7, 6.0  ;;  %v996_v30 = vshrl.u32 %v3409_v36, 16 }
 0x122   : > { %v3473_v25 = vsel %vm3345_vm3, 0, %v879_v4  ;;  %1774 = vmatmul.mubr.bf16.gmra.mrb[4].mxu1 %v3357_v9  ;;  %v639_v29 = vmin.f32 %v619_v14, 6.0  ;;  %v1000_v35 = vrot.slane %v998_v16, 1  ;;  %v1003_v41 = vshll.u32 %v3454_v10, 16  ;;  %2743 = vmatpush3.bf16.msra.mxu0 %v2983_v63  ;;  %v2971_v9 = vld [vmem:[%s3917_s5 + $0x118] sm:$0xff]  }
 0x123   : > { %1781 = vmatprep.mubr.bf16.mxu1 %v3463_v12  ;;  %v3486_v22 = vsel %vm1079_vm4, %v1086_v57, %v1087_v61  ;;  %v3488_v5 = vpack.c.bf16 %v641_v21, %v640_v13  ;;  %2677 = vmatpush3.bf16.msra.mxu1 %v2969_v0  ;;  %v733_v43 = vstv %s3458_s11  ;;  %v1010_v48 = vshll.u32 %v3473_v25, 16  ;;  %v2989_v61 = vld [vmem:[%s3917_s5 + $0x1a8] sm:$0xff]  }
 0x124   : > { %v841_v47 = vpack.c.bf16 %v639_v29, %v638_v20  ;;  %2678 = vmatprep.subr.bf16.mxu1 %v2970_v19  ;;  %v886_v50 = vor.u32 %v884_v54, %v3469_v44  ;;  %v3506_v51 = vsel %vm3345_vm3, %v876_v55, 0  ;;  %2744 = vmatprep.subr.bf16.mxu0 %v2984_v28  ;;  %v1001_v56 = vor.u32 %v1000_v35, %v996_v30  ;;  %v2990_v19 = vld [vmem:[%s3917_s5 + $0x1f0] sm:$0xff]  }
 0x125   : > { %1879 = vmatmul.mubr.bf16.gmra.mrb[28].mxu0 %v3486_v22  ;;  %v1005_v59 = vrot.slane %v1003_v41, 1  ;;  %vm3508_vm6 = vcmp.eq.s32.totalorder %v733_v43, 1  ;;  %v1089_v54 = vrot.slane %v3409_v36, 1  ;;  %v1090_v62 = vrot.slane %v3454_v10, 1  ;;  %v2980_v10 = vld [vmem:[%s3917_s5 + $0x168] sm:$0xff]   ;;  %v2991_v28 = vld [vmem:[%s3917_s5 + $0x1b0] sm:$0xff]  }
 0x126   : > { %1886 = vmatprep.mubr.bf16.mxu0 %v3473_v25  ;;  %v888_v52 = vshrl.u32 %v841_v47, 16  ;;  %2745 = vmatpush3.bf16.msra.mxu0 %v2985_v42  ;;  %v1008_v55 = vshrl.u32 %v3473_v25, 16  ;;  %v600_v0 = vadd.f32 %v3434_v53, %v3334_v8  ;;  %v1012_v63 = vrot.slane %v1010_v48, 1  ;;  %v2982_v41 = vld [vmem:[%s3917_s5 + $0x128] sm:$0xff]   ;;  %v2993_v42 = vld [vmem:[%s3917_s5 + $0x1f8] sm:$0xff]  }
 0x127   : > { %2679 = vmatpush3.bf16.msra.mxu1 %v2971_v9  ;;  %2746 = vmatprep.subr.bf16.mxu0 %v2987_v46  ;;  %v1015_v4 = vshll.u32 %v3506_v51, 16  ;;  %v592_v6 = vadd.f32 %v3334_v8, %v3440_v60  ;;  %v603_v7 = vadd.f32 %v2851_v2, %v3334_v8  ;;  %v891_v53 = vshll.u32 %v841_v47, 16  ;;  %v2986_v47 = vld [vmem:[%s3917_s5 + $0x170] sm:$0xff]  }
 0x128   : > { %2680 = vmatprep.subr.bf16.mxu1 %v2974_v49  ;;  %v3530_v13 = vrot.slane %v888_v52, 7  ;;  %v3534_v14 = vsel %vm3345_vm3, 0, %v886_v50  ;;  %v624_v16 = vmax.f32 %v600_v0, 0.0  ;;  %v895_v60 = vshrl.u32 %v3488_v5, 16 }
 0x129   : > { %v3542_v2 = vsel %vm958_vm5, %v1001_v56, %v1005_v59  ;;  %v622_v20 = vmax.f32 %v592_v6, 0.0  ;;  %v625_v21 = vmax.f32 %v603_v7, 0.0  ;;  %v898_v29 = vshll.u32 %v3488_v5, 16 }
 0x12a   : > { %1782 = vmatmul.mubr.bf16.gmra.mrb[8].mxu1 %v3384_v3  ;;  %2747 = vmatpush3.bf16.msra.mxu0 %v2989_v61  ;;  %v3550_v30 = vsel %vm1079_vm4, %v1089_v54, %v1090_v62  ;;  %v644_v35 = vmin.f32 %v624_v16, 6.0  ;;  %v1013_v9 = vor.u32 %v1012_v63, %v1008_v55  ;;  %v1017_v43 = vrot.slane %v1015_v4, 1  ;;  %v2995_v61 = vld [vmem:[%s3917_s5 + $0x1b8] sm:$0xff]   ;;  %v2988_v55 = vld [vmem:[%s3917_s5 + $0x130] sm:$0xff]  }
 0x12b   : > { %1789 = vmatprep.mubr.bf16.mxu1 %v3542_v2  ;;  %2681 = vmatpush3.bf16.msra.mxu1 %v2976_v1  ;;  %v645_v5 = vmin.f32 %v625_v21, 6.0  ;;  %v595_v46 = vadd.f32 %v3334_v8, %v3460_v11  ;;  %v893_v48 = vor.u32 %v891_v53, %v3530_v13  ;;  %v953_v50 = vsel %vm3345_vm3, %v3469_v44, 0  ;;  %v2992_v4 = vld [vmem:[%s3917_s5 + $0x178] sm:$0xff]  }
 0x12c   : > { %2682 = vmatprep.subr.bf16.mxu1 %v2980_v10  ;;  %v833_v49 = vsel %vm3508_vm6, %v644_v35, 0.0  ;;  %v1022_v52 = vshll.u32 %v3534_v14, 16  ;;  %2748 = vmatprep.subr.bf16.mxu0 %v2990_v19  ;;  %v3572_v8 = vrot.slane %v895_v60, 7  ;;  %v642_v11 = vmin.f32 %v622_v20, 6.0 }
 0x12d   : > { %1887 = vmatmul.mubr.bf16.gmra.mrb[32].mxu0 %v3550_v30  ;;  %v834_v56 = vsel %vm3508_vm6, %v645_v5, 0.0  ;;  %v623_v59 = vmax.f32 %v595_v46, 0.0  ;;  %v1092_v54 = vrot.slane %v3473_v25, 1  ;;  %v1093_v62 = vrot.slane %v3506_v51, 1 }
 0x12e   : > { %1894 = vmatprep.mubr.bf16.mxu0 %v3534_v14  ;;  %2749 = vmatpush3.bf16.msra.mxu0 %v2991_v28  ;;  %v844_v44 = vpack.c.bf16 %v834_v56, %v833_v49  ;;  %v3585_v57 = vsel %vm958_vm5, %v1013_v9, %v1017_v43  ;;  %v1020_v0 = vshrl.u32 %v3534_v14, 16  ;;  %v1027_v1 = vshll.u32 %v953_v50, 16  ;;  %v2994_v28 = vld [vmem:[%s3917_s5 + $0x138] sm:$0xff]  }
 0x12f   : > { %2683 = vmatpush3.bf16.msra.mxu1 %v2982_v41  ;;  %2750 = vmatprep.subr.bf16.mxu0 %v2993_v42  ;;  %v643_v63 = vmin.f32 %v623_v59, 6.0  ;;  %v1024_v7 = vrot.slane %v1022_v52, 1  ;;  %v3593_v10 = vsel %vm3345_vm3, 0, %v893_v48  ;;  %v900_v53 = vor.u32 %v898_v29, %v3572_v8  ;;  %v3610_v42 = vld [vmem:[%s3917_s5 + $0x200] sm:$0xff]  }
 0x130   : > { %2684 = vmatprep.subr.bf16.mxu1 %v2986_v47  ;;  %v909_v51 = vshrl.u32 %v844_v44, 16  ;;  %v912_v6 = vshll.u32 %v844_v44, 16  ;;  %v3599_v19 = vsel %vm1079_vm4, %v1092_v54, %v1093_v62  ;;  %v1095_v20 = vrot.slane %v3534_v14, 1 }
 0x131   : > { %v843_v16 = vpack.c.bf16 %v643_v63, %v642_v11  ;;  %v1096_v21 = vrot.slane %v953_v50, 1  ;;  %v1034_v41 = vshll.u32 %v3593_v10, 16  ;;  %v1025_v43 = vor.u32 %v1024_v7, %v1020_v0 }
 0x132   : > { %1790 = vmatmul.mubr.bf16.gmra.mrb[12].mxu1 %v3409_v36  ;;  %2751 = vmatpush3.bf16.msra.mxu0 %v2995_v61  ;;  %v911_v60 = vrot.slane %v909_v51, 7  ;;  %v1029_v5 = vrot.slane %v1027_v1, 1  ;;  %v954_v46 = vsel %vm3345_vm3, %v3530_v13, 0  ;;  %v3618_v48 = vsel %vm3345_vm3, 0, %v900_v53 }
 0x133   : > { %1797 = vmatprep.mubr.bf16.mxu1 %v3585_v57  ;;  %2685 = vmatpush3.bf16.msra.mxu1 %v2988_v55  ;;  %v902_v29 = vshrl.u32 %v843_v16, 16  ;;  %v905_v35 = vshll.u32 %v843_v16, 16  ;;  %v3627_v52 = vsel %vm1079_vm4, %v1095_v20, %v1096_v21  ;;  %v1032_v11 = vshrl.u32 %v3593_v10, 16 }
 0x134   : > { %2686 = vmatprep.subr.bf16.mxu1 %v2992_v4  ;;  %v914_v9 = vor.u32 %v912_v6, %v911_v60  ;;  %v957_v49 = vsel %vm3345_vm3, %v911_v60, 0  ;;  %v1036_v59 = vrot.slane %v1034_v41, 1  ;;  %v1039_v61 = vshll.u32 %v954_v46, 16 }
 0x135   : > { %1895 = vmatmul.mubr.bf16.gmra.mrb[36].mxu0 %v3599_v19  ;;  %v904_v47 = vrot.slane %v902_v29, 7  ;;  %v1139_v56 = vshll.u32 %v957_v49, 16  ;;  %v3634_v62 = vsel %vm958_vm5, %v1025_v43, %v1029_v5  ;;  %v1147_v51 = vrot.slane %v957_v49, 1 }
 0x136   : > { %1902 = vmatprep.mubr.bf16.mxu0 %v3593_v10  ;;  %v3624_v50 = vsel %vm3345_vm3, 0, %v914_v9  ;;  %v1037_v60 = vor.u32 %v1036_v59, %v1032_v11  ;;  %v1041_v20 = vrot.slane %v1039_v61, 1  ;;  %v1098_v9 = vrot.slane %v3593_v10, 1 }
 0x137   : > { %2687 = vmatpush3.bf16.msra.mxu1 %v2994_v28  ;;  %v907_v13 = vor.u32 %v905_v35, %v904_v47  ;;  %v956_v54 = vsel %vm3345_vm3, %v904_v47, 0  ;;  %v1132_v55 = vshrl.u32 %v3624_v50, 16  ;;  %v1134_v0 = vshll.u32 %v3624_v50, 16 }
 0x138   : > { %2852 = vmatprep.subr.bf16.mxu1 %v3610_v42  ;;  %v1120_v44 = vshll.u32 %v956_v54, 16  ;;  %v1128_v63 = vrot.slane %v956_v54, 1  ;;  %v1146_v4 = vrot.slane %v3624_v50, 1  ;;  %v1141_v16 = vrot.slane %v1139_v56, 1 }
 0x139   : > { %v3641_v1 = vsel %vm3345_vm3, 0, %v907_v13  ;;  %v1136_v53 = vrot.slane %v1134_v0, 1  ;;  %v1046_v43 = vshll.u32 %v3618_v48, 16  ;;  %v1099_v47 = vrot.slane %v954_v46, 1 }
 0x13a   : > { %1798 = vmatmul.mubr.bf16.gmra.mrb[16].mxu1 %v3473_v25  ;;  %v1113_v6 = vshrl.u32 %v3641_v1, 16  ;;  %v1115_v7 = vshll.u32 %v3641_v1, 16  ;;  %v1127_v21 = vrot.slane %v3641_v1, 1  ;;  %v3650_v28 = vsel %vm1079_vm4, %v1146_v4, %v1147_v51  ;;  %v2997_v51 = vld [vmem:[%s3917_s5 + $0x208] sm:$0xff]  }
 0x13b   : > { %1805 = vmatprep.mubr.bf16.mxu1 %v3634_v62  ;;  %v1122_v35 = vrot.slane %v1120_v44, 1  ;;  %v1137_v41 = vor.u32 %v1136_v53, %v1132_v55  ;;  %v955_v49 = vsel %vm3345_vm3, %v3572_v8, 0  ;;  %v3665_v13 = vsel %vm958_vm5, %v1037_v60, %v1041_v20 }
 0x13c   : > { %v1117_v29 = vrot.slane %v1115_v7, 1  ;;  %v3656_v5 = vsel %vm1079_vm4, %v1127_v21, %v1128_v63  ;;  %v1044_v61 = vshrl.u32 %v3618_v48, 16  ;;  %v1048_v54 = vrot.slane %v1046_v43, 1 }
 0x13d   : > { %1903 = vmatmul.mubr.bf16.gmra.mrb[40].mxu0 %v3627_v52  ;;  %v3662_v56 = vsel %vm958_vm5, %v1137_v41, %v1141_v16  ;;  %v1051_v46 = vshll.u32 %v955_v49, 16  ;;  %v3674_v58 = vsel %vm1079_vm4, %v1098_v9, %v1099_v47  ;;  %v1101_v55 = vrot.slane %v3618_v48, 1 }
 0x13e   : > { %1910 = vmatprep.mubr.bf16.mxu0 %v3618_v48  ;;  %v1118_v11 = vor.u32 %v1117_v29, %v1113_v6  ;;  %v1049_v8 = vor.u32 %v1048_v54, %v1044_v61  ;;  %v1102_v0 = vrot.slane %v955_v49, 1 }
 0x13f   : > { %v1053_v44 = vrot.slane %v1051_v46, 1 }
 0x140   : > { %v3668_v59 = vsel %vm958_vm5, %v1118_v11, %v1122_v35  ;;  %v1103_v4 = vsel %vm1079_vm4, %v1101_v55, %v1102_v0 }
 0x141   : > { %v1054_v63 = vsel %vm958_vm5, %v1049_v8, %v1053_v44 }
 0x142   : > { %1806 = vmatmul.mubr.bf16.gmra.mrb[20].mxu1 %v3534_v14 }
 0x143   : > { %1813 = vmatprep.mubr.bf16.mxu1 %v3665_v13 }
 0x145   : > { %1911 = vmatmul.mubr.bf16.gmra.mrb[44].mxu0 %v3674_v58 }
 0x146   : > { %1918 = vmatprep.mubr.bf16.mxu0 %v3641_v1 }
 0x14a   : > { %1814 = vmatmul.mubr.bf16.gmra.mrb[24].mxu1 %v3593_v10 }
 0x14b   : > { %1821 = vmatprep.mubr.bf16.mxu1 %v1054_v63 }
 0x14d   : > { %1919 = vmatmul.mubr.bf16.gmra.mrb[48].mxu0 %v1103_v4 }
 0x14e   : > { %2056 = vmatprep.mubr.bf16.mxu0 %v3463_v12 }
 0x152   : > { %1822 = vmatmul.mubr.bf16.gmra.mrb[28].mxu1 %v3618_v48 }
 0x153   : > { %1959 = vmatprep.mubr.bf16.mxu1 %v3419_v18  ;;  %v2998_v18 = vld [vmem:[%s3917_s5 + $0x210] sm:$0xff]  }
 0x155   : > { %2057 = vmatmul.mubr.bf16.vlgmr.msra.gmra.mrb[52].mxu0 %v3384_v3  ;;  %v2999_v3 = vld [vmem:[%s3917_s5 + $0x218] sm:$0xff]  }
 0x156   : > { %2064 = vmatprep.mubr.bf16.mxu0 %v3542_v2 }
 0x15a   : > { %1960 = vmatmul.mubr.bf16.vlgmr.msra.gmra.mrb[32].mxu1 %v3416_v45  ;;  %v3001_v45 = vld [vmem:[%s3917_s5 + $0x228] sm:$0xff]  }
 0x15b   : > { %2853 = vmatpush3.bf16.msra.mxu1 %v3610_v42  ;;  %1967 = vmatprep.mubr.bf16.mxu1 %v3486_v22 }
 0x15c   : > { %2854 = vmatprep.subr.bf16.mxu1 %v2997_v51 }
 0x15d   : > { %2065 = vmatmul.mubr.bf16.gmra.mrb[56].mxu0 %v3409_v36  ;;  %v3000_v36 = vld [vmem:[%s3917_s5 + $0x220] sm:$0xff]  }
 0x15e   : > { %2072 = vmatprep.mubr.bf16.mxu0 %v3585_v57 }
 0x15f   : > { %2855 = vmatpush3.bf16.msra.mxu1 %v2997_v51 }
 0x160   : > { %2856 = vmatprep.subr.bf16.mxu1 %v2998_v18 }
 0x162   : > { %1968 = vmatmul.mubr.bf16.gmra.mrb[36].mxu1 %v3463_v12  ;;  %v3002_v12 = vld [vmem:[%s3917_s5 + $0x230] sm:$0xff]  }
 0x163   : > { %1975 = vmatprep.mubr.bf16.mxu1 %v3550_v30  ;;  %2857 = vmatpush3.bf16.msra.mxu1 %v2998_v18 }
 0x164   : > { %2858 = vmatprep.subr.bf16.mxu1 %v2999_v3 }
 0x165   : > { %2073 = vmatmul.mubr.bf16.gmra.mrb[60].mxu0 %v3473_v25  ;;  %v3003_v25 = vld [vmem:[%s3917_s5 + $0x238] sm:$0xff]  }
 0x166   : > { %2080 = vmatprep.mubr.bf16.mxu0 %v3634_v62 }
 0x167   : > { %2859 = vmatpush3.bf16.msra.mxu1 %v2999_v3 }
 0x168   : > { %2860 = vmatprep.subr.bf16.mxu1 %v3000_v36 }
 0x16a   : > { %1976 = vmatmul.mubr.bf16.gmra.mrb[40].mxu1 %v3542_v2 }
 0x16b   : > { %1983 = vmatprep.mubr.bf16.mxu1 %v3599_v19  ;;  %2861 = vmatpush3.bf16.msra.mxu1 %v3000_v36 }
 0x16c   : > { %2862 = vmatprep.subr.bf16.mxu1 %v3001_v45 }
 0x16d   : > { %2081 = vmatmul.mubr.bf16.gmra.mrb[64].mxu0 %v3534_v14 }
 0x16e   : > { %2088 = vmatprep.mubr.bf16.mxu0 %v3665_v13 }
 0x16f   : > { %2863 = vmatpush3.bf16.msra.mxu1 %v3001_v45 }
 0x170   : > { %2864 = vmatprep.subr.bf16.mxu1 %v3002_v12 }
 0x172   : > { %1984 = vmatmul.mubr.bf16.gmra.mrb[44].mxu1 %v3585_v57 }
 0x173   : > { %1991 = vmatprep.mubr.bf16.mxu1 %v3627_v52  ;;  %2865 = vmatpush3.bf16.msra.mxu1 %v3002_v12 }
 0x174   : > { %2866 = vmatprep.subr.bf16.mxu1 %v3003_v25 }
 0x175   : > { %2089 = vmatmul.mubr.bf16.gmra.mrb[68].mxu0 %v3593_v10 }
 0x176   : > { %2096 = vmatprep.mubr.bf16.mxu0 %v1054_v63 }
 0x177   : > { %2867 = vmatpush3.bf16.msra.mxu1 %v3003_v25 }
 0x17a   : > { %1992 = vmatmul.mubr.bf16.gmra.mrb[48].mxu1 %v3634_v62 }
 0x17b   : > { %1999 = vmatprep.mubr.bf16.mxu1 %v3674_v58 }
 0x17d   : > { %2097 = vmatmul.mubr.bf16.gmra.mrb[72].mxu0 %v3618_v48 }
 0x17e   : > { %2104 = vmatprep.mubr.bf16.mxu0 %v3668_v59 }
 0x182   : > { %2000 = vmatmul.mubr.bf16.gmra.mrb[52].mxu1 %v3665_v13 }
 0x183   : > { %2007 = vmatprep.mubr.bf16.mxu1 %v1103_v4 }
 0x185   : > { %2105 = vmatmul.mubr.bf16.gmra.mrb[76].mxu0 %v3641_v1 }
 0x186   : > { %2112 = vmatprep.mubr.bf16.mxu0 %v3662_v56 }
 0x18a   : > { %2008 = vmatmul.mubr.bf16.gmra.mrb[56].mxu1 %v1054_v63 }
 0x18b   : > { %2015 = vmatprep.mubr.bf16.mxu1 %v3656_v5 }
 0x18d   : > { %2113 = vmatmul.mubr.bf16.gmra.mrb[80].mxu0 %v3624_v50 }
 0x192   : > { %2016 = vmatmul.mubr.bf16.gmra.mrb[60].mxu1 %v3668_v59 }
 0x193   : > { %2868 = vmatprep.mubr.bf16.mxu1 %v3486_v22 }
 0x19a   : > { %2869 = vmatmul.mubr.bf16.vlgmr.msra.gmra.mrb[64].mxu1 %v3550_v30  ;;  %v3744_v30 = vld [vmem:[%s3918_s6] ss:$0 sm:$0xff] }
 0x19b   : > { %2872 = vmatprep.mubr.bf16.mxu1 %v3599_v19 }
 0x1a2   : > { %2873 = vmatmul.mubr.bf16.gmra.mrb[68].mxu1 %v3627_v52 }
 0x1a3   : > { %2876 = vmatprep.mubr.bf16.mxu1 %v3674_v58 }
 0x1aa   : > { %2877 = vmatmul.mubr.bf16.gmra.mrb[72].mxu1 %v1103_v4 }
 0x1ab   : > { %2880 = vmatprep.mubr.bf16.mxu1 %v3656_v5 }
 0x1b2   : > { %2881 = vmatmul.mubr.bf16.gmra.mrb[76].mxu1 %v3650_v28 }
 0x1e8   : > { %v2624_v14 = vpop.f32.mrb[20].mxu0 }
 0x1e9   : > { %v2625_v2 = vpop.f32.mrb[21].mxu0 }
 0x1ea   : > { %v2626_v57 = vadd.f32 %v2625_v2, %v2624_v14  ;;  %v2627_v10 = vpop.f32.mrb[22].mxu0 }
 0x1eb   : > { %v2628_v42 = vpop.f32.mrb[23].mxu0 }
 0x1ec   : > { %v2629_v48 = vadd.f32 %v2628_v42, %v2627_v10 }
 0x1ed   : > { %v2560_v22 = vpop.f32.mrb[0].mxu1 }
 0x1ee   : > { %v2561_v19 = vpop.f32.mrb[1].mxu1 }
 0x1ef   : > { %v2562_v50 = vadd.f32 %v2561_v19, %v2560_v22  ;;  %v2563_v52 = vpop.f32.mrb[2].mxu1 }
 0x1f0   : > { %v2630_v62 = vpop.f32.mrb[24].mxu0  ;;  %v2564_v1 = vpop.f32.mrb[3].mxu1 }
 0x1f1   : > { %v2631_v6 = vpop.f32.mrb[25].mxu0  ;;  %v1768_v7 = vadd.f32 %v2562_v50, %v3744_v30  ;;  %v2565_v53 = vadd.f32 %v2564_v1, %v2563_v52 }
 0x1f2   : > { %v2632_v16 = vadd.f32 %v2631_v6, %v2630_v62  ;;  %v2633_v60 = vpop.f32.mrb[26].mxu0 }
 0x1f3   : > { %v2634_v20 = vpop.f32.mrb[27].mxu0  ;;  %v1771_v21 = vadd.f32 %v2565_v53, %v3744_v30  ;;  %v3748_v29 = vadd.f32 %v2626_v57, %v1768_v7 }
 0x1f4   : > { %v2635_v28 = vadd.f32 %v2634_v20, %v2633_v60 }
 0x1f5   : > { %v2566_v35 = vpop.f32.mrb[4].mxu1  ;;  %v3750_v41 = vadd.f32 %v2629_v48, %v1771_v21 }
 0x1f6   : > { %v2567_v9 = vpop.f32.mrb[5].mxu1 }
 0x1f7   : > { %v2568_v43 = vadd.f32 %v2567_v9, %v2566_v35  ;;  %v2569_v5 = vpop.f32.mrb[6].mxu1 }
 0x1f8   : > { %v2636_v47 = vpop.f32.mrb[28].mxu0  ;;  %v2570_v49 = vpop.f32.mrb[7].mxu1 }
 0x1f9   : > { %v2637_v11 = vpop.f32.mrb[29].mxu0  ;;  %v1776_v56 = vadd.f32 %v2568_v43, %v3744_v30  ;;  %v2571_v13 = vadd.f32 %v2570_v49, %v2569_v5 }
 0x1fa   : > { %v2638_v59 = vadd.f32 %v2637_v11, %v2636_v47  ;;  %v2639_v61 = vpop.f32.mrb[30].mxu0 }
 0x1fb   : > { %v2640_v54 = vpop.f32.mrb[31].mxu0  ;;  %v1779_v46 = vadd.f32 %v2571_v13, %v3744_v30  ;;  %v3754_v8 = vadd.f32 %v2632_v16, %v1776_v56 }
 0x1fc   : > { %v2641_v58 = vadd.f32 %v2640_v54, %v2639_v61 }
 0x1fd   : > { %v2572_v44 = vpop.f32.mrb[8].mxu1  ;;  %v3756_v55 = vadd.f32 %v2635_v28, %v1779_v46 }
 0x1fe   : > { %v2573_v0 = vpop.f32.mrb[9].mxu1 }
 0x1ff   : > { %v2574_v63 = vadd.f32 %v2573_v0, %v2572_v44  ;;  %v2575_v4 = vpop.f32.mrb[10].mxu1 }
 0x200   : > { %v2642_v51 = vpop.f32.mrb[32].mxu0  ;;  %v2576_v18 = vpop.f32.mrb[11].mxu1 }
 0x201   : > { %v2643_v3 = vpop.f32.mrb[33].mxu0  ;;  %v1784_v36 = vadd.f32 %v2574_v63, %v3744_v30  ;;  %v2577_v45 = vadd.f32 %v2576_v18, %v2575_v4 }
 0x202   : > { %v2644_v12 = vadd.f32 %v2643_v3, %v2642_v51  ;;  %v2645_v25 = vpop.f32.mrb[34].mxu0 }
 0x203   : > { %v2646_v14 = vpop.f32.mrb[35].mxu0  ;;  %v1787_v2 = vadd.f32 %v2577_v45, %v3744_v30  ;;  %v3760_v10 = vadd.f32 %v2638_v59, %v1784_v36 }
 0x204   : > { %v2647_v57 = vadd.f32 %v2646_v14, %v2645_v25 }
 0x205   : > { %v2578_v42 = vpop.f32.mrb[12].mxu1  ;;  %v3762_v48 = vadd.f32 %v2641_v58, %v1787_v2 }
 0x206   : > { %v2579_v22 = vpop.f32.mrb[13].mxu1 }
 0x207   : > { %v2580_v19 = vadd.f32 %v2579_v22, %v2578_v42  ;;  %v2581_v50 = vpop.f32.mrb[14].mxu1 }
 0x208   : > { %v2648_v52 = vpop.f32.mrb[36].mxu0  ;;  %v2582_v62 = vpop.f32.mrb[15].mxu1 }
 0x209   : > { %v2649_v1 = vpop.f32.mrb[37].mxu0  ;;  %v1792_v6 = vadd.f32 %v2580_v19, %v3744_v30  ;;  %v2583_v7 = vadd.f32 %v2582_v62, %v2581_v50 }
 0x20a   : > { %v2650_v53 = vadd.f32 %v2649_v1, %v2648_v52  ;;  %v2651_v16 = vpop.f32.mrb[38].mxu0 }
 0x20b   : > { %v2652_v60 = vpop.f32.mrb[39].mxu0  ;;  %v1795_v20 = vadd.f32 %v2583_v7, %v3744_v30  ;;  %v3766_v28 = vadd.f32 %v2644_v12, %v1792_v6 }
 0x20c   : > { %v2653_v21 = vadd.f32 %v2652_v60, %v2651_v16 }
 0x20d   : > { %v2584_v35 = vpop.f32.mrb[16].mxu1  ;;  %v3768_v9 = vadd.f32 %v2647_v57, %v1795_v20 }
 0x20e   : > { %v2585_v43 = vpop.f32.mrb[17].mxu1 }
 0x20f   : > { %v2586_v5 = vadd.f32 %v2585_v43, %v2584_v35  ;;  %v2587_v47 = vpop.f32.mrb[18].mxu1 }
 0x210   : > { %v2654_v49 = vpop.f32.mrb[40].mxu0  ;;  %v2588_v11 = vpop.f32.mrb[19].mxu1 }
 0x211   : > { %v2655_v56 = vpop.f32.mrb[41].mxu0  ;;  %v1800_v13 = vadd.f32 %v2586_v5, %v3744_v30  ;;  %v2589_v59 = vadd.f32 %v2588_v11, %v2587_v47 }
 0x212   : > { %v2656_v61 = vadd.f32 %v2655_v56, %v2654_v49  ;;  %v2657_v54 = vpop.f32.mrb[42].mxu0 }
 0x213   : > { %v2658_v46 = vpop.f32.mrb[43].mxu0  ;;  %v1803_v58 = vadd.f32 %v2589_v59, %v3744_v30  ;;  %v3772_v0 = vadd.f32 %v2650_v53, %v1800_v13 }
 0x214   : > { %v2659_v44 = vadd.f32 %v2658_v46, %v2657_v54 }
 0x215   : > { %v2590_v63 = vpop.f32.mrb[20].mxu1  ;;  %v3774_v4 = vadd.f32 %v2653_v21, %v1803_v58 }
 0x216   : > { %v2591_v51 = vpop.f32.mrb[21].mxu1 }
 0x217   : > { %v2592_v18 = vadd.f32 %v2591_v51, %v2590_v63  ;;  %v2593_v3 = vpop.f32.mrb[22].mxu1 }
 0x218   : > { %v2660_v36 = vpop.f32.mrb[44].mxu0  ;;  %v2594_v45 = vpop.f32.mrb[23].mxu1 }
 0x219   : > { %v2661_v12 = vpop.f32.mrb[45].mxu0  ;;  %v1808_v25 = vadd.f32 %v2592_v18, %v3744_v30  ;;  %v2595_v14 = vadd.f32 %v2594_v45, %v2593_v3 }
 0x21a   : > { %v2662_v2 = vadd.f32 %v2661_v12, %v2660_v36  ;;  %v2663_v57 = vpop.f32.mrb[46].mxu0 }
 0x21b   : > { %v2664_v42 = vpop.f32.mrb[47].mxu0  ;;  %v1811_v22 = vadd.f32 %v2595_v14, %v3744_v30  ;;  %v3778_v50 = vadd.f32 %v2656_v61, %v1808_v25 }
 0x21c   : > { %v2665_v19 = vadd.f32 %v2664_v42, %v2663_v57 }
 0x21d   : > { %v2596_v52 = vpop.f32.mrb[24].mxu1  ;;  %v3780_v62 = vadd.f32 %v2659_v44, %v1811_v22 }
 0x21e   : > { %v2597_v1 = vpop.f32.mrb[25].mxu1 }
 0x21f   : > { %v2598_v6 = vadd.f32 %v2597_v1, %v2596_v52  ;;  %v2599_v7 = vpop.f32.mrb[26].mxu1 }
 0x220   : > { %v2666_v53 = vpop.f32.mrb[48].mxu0  ;;  %v2600_v16 = vpop.f32.mrb[27].mxu1 }
 0x221   : > { %v2667_v60 = vpop.f32.mrb[49].mxu0  ;;  %v1816_v20 = vadd.f32 %v2598_v6, %v3744_v30  ;;  %v2601_v21 = vadd.f32 %v2600_v16, %v2599_v7 }
 0x222   : > { %v2668_v35 = vadd.f32 %v2667_v60, %v2666_v53  ;;  %v2669_v43 = vpop.f32.mrb[50].mxu0 }
 0x223   : > { %v2670_v5 = vpop.f32.mrb[51].mxu0  ;;  %v1819_v47 = vadd.f32 %v2601_v21, %v3744_v30  ;;  %v3784_v11 = vadd.f32 %v2662_v2, %v1816_v20 }
 0x224   : > { %v2671_v49 = vadd.f32 %v2670_v5, %v2669_v43 }
 0x225   : > { %v2602_v56 = vpop.f32.mrb[28].mxu1  ;;  %v3786_v13 = vadd.f32 %v2665_v19, %v1819_v47 }
 0x226   : > { %v2603_v59 = vpop.f32.mrb[29].mxu1 }
 0x227   : > { %v2604_v61 = vadd.f32 %v2603_v59, %v2602_v56  ;;  %v2605_v54 = vpop.f32.mrb[30].mxu1 }
 0x228   : > { %v2752_v46 = vpop.f32.mrb[52].mxu0  ;;  %v2606_v58 = vpop.f32.mrb[31].mxu1 }
 0x229   : > { %v2753_v44 = vpop.f32.mrb[53].mxu0  ;;  %v1824_v63 = vadd.f32 %v2604_v61, %v3744_v30  ;;  %v2607_v51 = vadd.f32 %v2606_v58, %v2605_v54 }
 0x22a   : > { %v2754_v18 = vadd.f32 %v2753_v44, %v2752_v46  ;;  %v2755_v3 = vpop.f32.mrb[54].mxu0 }
 0x22b   : > { %v2756_v36 = vpop.f32.mrb[55].mxu0  ;;  %v1827_v45 = vadd.f32 %v2607_v51, %v3744_v30  ;;  %v3790_v25 = vadd.f32 %v2668_v35, %v1824_v63 }
 0x22c   : > { %v2757_v12 = vadd.f32 %v2756_v36, %v2755_v3 }
 0x22d   : > { %v2688_v14 = vpop.f32.mrb[32].mxu1  ;;  %v3792_v2 = vadd.f32 %v2671_v49, %v1827_v45 }
 0x22e   : > { %v2689_v57 = vpop.f32.mrb[33].mxu1 }
 0x22f   : > { %v2690_v42 = vadd.f32 %v2689_v57, %v2688_v14  ;;  %v2691_v22 = vpop.f32.mrb[34].mxu1 }
 0x230   : > { %v2758_v19 = vpop.f32.mrb[56].mxu0  ;;  %v2692_v52 = vpop.f32.mrb[35].mxu1 }
 0x231   : > { %v2759_v1 = vpop.f32.mrb[57].mxu0  ;;  %v1962_v6 = vadd.f32 %v2690_v42, %v3748_v29  ;;  %v2693_v7 = vadd.f32 %v2692_v52, %v2691_v22 }
 0x232   : > { %v2760_v53 = vadd.f32 %v2759_v1, %v2758_v19  ;;  %v2761_v16 = vpop.f32.mrb[58].mxu0 }
 0x233   : > { %v2762_v60 = vpop.f32.mrb[59].mxu0  ;;  %v1965_v30 = vadd.f32 %v2693_v7, %v3750_v41  ;;  %v3796_v21 = vadd.f32 %v2754_v18, %v1962_v6 }
 0x234   : > { %v2763_v20 = vadd.f32 %v2762_v60, %v2761_v16 }
 0x235   : > { %v2694_v35 = vpop.f32.mrb[36].mxu1  ;;  %v3798_v43 = vadd.f32 %v2757_v12, %v1965_v30 }
 0x236   : > { %v2695_v5 = vpop.f32.mrb[37].mxu1 }
 0x237   : > { %v2696_v47 = vadd.f32 %v2695_v5, %v2694_v35  ;;  %v2697_v49 = vpop.f32.mrb[38].mxu1 }
 0x238   : > { %v2764_v56 = vpop.f32.mrb[60].mxu0  ;;  %v2698_v59 = vpop.f32.mrb[39].mxu1 }
 0x239   : > { %v2765_v61 = vpop.f32.mrb[61].mxu0  ;;  %v1970_v29 = vadd.f32 %v2696_v47, %v3754_v8  ;;  %v2699_v54 = vadd.f32 %v2698_v59, %v2697_v49 }
 0x23a   : > { %v2766_v46 = vadd.f32 %v2765_v61, %v2764_v56  ;;  %v2767_v58 = vpop.f32.mrb[62].mxu0 }
 0x23b   : > { %v2768_v44 = vpop.f32.mrb[63].mxu0  ;;  %v1973_v41 = vadd.f32 %v2699_v54, %v3756_v55  ;;  %v3802_v51 = vadd.f32 %v2760_v53, %v1970_v29 }
 0x23c   : > { %v2769_v63 = vadd.f32 %v2768_v44, %v2767_v58 }
 0x23d   : > { %v2700_v18 = vpop.f32.mrb[40].mxu1  ;;  %v3804_v3 = vadd.f32 %v2763_v20, %v1973_v41 }
 0x23e   : > { %v2701_v36 = vpop.f32.mrb[41].mxu1 }
 0x23f   : > { %v2702_v45 = vadd.f32 %v2701_v36, %v2700_v18  ;;  %v2703_v12 = vpop.f32.mrb[42].mxu1 }
 0x240   : > { %v2770_v14 = vpop.f32.mrb[64].mxu0  ;;  %v2704_v57 = vpop.f32.mrb[43].mxu1 }
 0x241   : > { %v2771_v42 = vpop.f32.mrb[65].mxu0  ;;  %v1978_v8 = vadd.f32 %v2702_v45, %v3760_v10  ;;  %v2705_v22 = vadd.f32 %v2704_v57, %v2703_v12 }
 0x242   : > { %v2772_v19 = vadd.f32 %v2771_v42, %v2770_v14  ;;  %v2773_v52 = vpop.f32.mrb[66].mxu0 }
 0x243   : > { %v2774_v1 = vpop.f32.mrb[67].mxu0  ;;  %v1981_v55 = vadd.f32 %v2705_v22, %v3762_v48  ;;  %v3808_v7 = vadd.f32 %v2766_v46, %v1978_v8 }
 0x244   : > { %v2775_v6 = vadd.f32 %v2774_v1, %v2773_v52 }
 0x245   : > { %v2706_v53 = vpop.f32.mrb[44].mxu1  ;;  %v3810_v16 = vadd.f32 %v2769_v63, %v1981_v55 }
 0x246   : > { %v2707_v60 = vpop.f32.mrb[45].mxu1 }
 0x247   : > { %v2708_v30 = vadd.f32 %v2707_v60, %v2706_v53  ;;  %v2709_v20 = vpop.f32.mrb[46].mxu1 }
 0x248   : > { %v2776_v35 = vpop.f32.mrb[68].mxu0  ;;  %v2710_v5 = vpop.f32.mrb[47].mxu1 }
 0x249   : > { %v2777_v47 = vpop.f32.mrb[69].mxu0  ;;  %v1986_v10 = vadd.f32 %v2708_v30, %v3766_v28  ;;  %v2711_v49 = vadd.f32 %v2710_v5, %v2709_v20 }
 0x24a   : > { %v2778_v56 = vadd.f32 %v2777_v47, %v2776_v35  ;;  %v2779_v59 = vpop.f32.mrb[70].mxu0 }
 0x24b   : > { %v2780_v61 = vpop.f32.mrb[71].mxu0  ;;  %v1989_v48 = vadd.f32 %v2711_v49, %v3768_v9  ;;  %v3814_v54 = vadd.f32 %v2772_v19, %v1986_v10 }
 0x24c   : > { %v2781_v29 = vadd.f32 %v2780_v61, %v2779_v59 }
 0x24d   : > { %v2712_v46 = vpop.f32.mrb[48].mxu1  ;;  %v3816_v58 = vadd.f32 %v2775_v6, %v1989_v48 }
 0x24e   : > { %v2713_v44 = vpop.f32.mrb[49].mxu1 }
 0x24f   : > { %v2714_v41 = vadd.f32 %v2713_v44, %v2712_v46  ;;  %v2715_v63 = vpop.f32.mrb[50].mxu1 }
 0x250   : > { %v2782_v18 = vpop.f32.mrb[72].mxu0  ;;  %v2716_v36 = vpop.f32.mrb[51].mxu1 }
 0x251   : > { %v2783_v45 = vpop.f32.mrb[73].mxu0  ;;  %v1994_v28 = vadd.f32 %v2714_v41, %v3772_v0  ;;  %v2717_v12 = vadd.f32 %v2716_v36, %v2715_v63 }
 0x252   : > { %v2784_v14 = vadd.f32 %v2783_v45, %v2782_v18  ;;  %v2785_v57 = vpop.f32.mrb[74].mxu0 }
 0x253   : > { %v2786_v42 = vpop.f32.mrb[75].mxu0  ;;  %v1997_v9 = vadd.f32 %v2717_v12, %v3774_v4  ;;  %v3820_v22 = vadd.f32 %v2778_v56, %v1994_v28 }
 0x254   : > { %v2787_v8 = vadd.f32 %v2786_v42, %v2785_v57 }
 0x255   : > { %v2718_v19 = vpop.f32.mrb[52].mxu1  ;;  %v3822_v52 = vadd.f32 %v2781_v29, %v1997_v9 }
 0x256   : > { %v2719_v1 = vpop.f32.mrb[53].mxu1 }
 0x257   : > { %v2720_v55 = vadd.f32 %v2719_v1, %v2718_v19  ;;  %v2721_v6 = vpop.f32.mrb[54].mxu1 }
 0x258   : > { %v2788_v53 = vpop.f32.mrb[76].mxu0  ;;  %v2722_v60 = vpop.f32.mrb[55].mxu1 }
 0x259   : > { %v2789_v30 = vpop.f32.mrb[77].mxu0  ;;  %v2002_v0 = vadd.f32 %v2720_v55, %v3778_v50  ;;  %v2723_v20 = vadd.f32 %v2722_v60, %v2721_v6 }
 0x25a   : > { %v2790_v35 = vadd.f32 %v2789_v30, %v2788_v53  ;;  %v2791_v5 = vpop.f32.mrb[78].mxu0 }
 0x25b   : > { %v2792_v47 = vpop.f32.mrb[79].mxu0  ;;  %v2005_v4 = vadd.f32 %v2723_v20, %v3780_v62  ;;  %v3826_v49 = vadd.f32 %v2784_v14, %v2002_v0 }
 0x25c   : > { %v2793_v10 = vadd.f32 %v2792_v47, %v2791_v5 }
 0x25d   : > { %v2724_v56 = vpop.f32.mrb[56].mxu1  ;;  %v3828_v59 = vadd.f32 %v2787_v8, %v2005_v4 }
 0x25e   : > { %v2725_v61 = vpop.f32.mrb[57].mxu1 }
 0x25f   : > { %v2726_v48 = vadd.f32 %v2725_v61, %v2724_v56  ;;  %v2727_v29 = vpop.f32.mrb[58].mxu1  ;;  %v3004_v56 = vld [vmem:[%s3172_s15 + $0x10] sm:$0xff] }
 0x260   : > { %v2794_v46 = vpop.f32.mrb[80].mxu0  ;;  %v2728_v44 = vpop.f32.mrb[59].mxu1 }
 0x261   : > { %v2795_v41 = vpop.f32.mrb[81].mxu0  ;;  %v2010_v50 = vadd.f32 %v2726_v48, %v3784_v11  ;;  %v2729_v63 = vadd.f32 %v2728_v44, %v2727_v29  ;;  %v3005_v48 = vld [vmem:[%s3172_s15] sm:$0xff] }
 0x262   : > { %v2796_v18 = vadd.f32 %v2795_v41, %v2794_v46  ;;  %v2797_v36 = vpop.f32.mrb[82].mxu0 }
 0x263   : > { %v2798_v45 = vpop.f32.mrb[83].mxu0  ;;  %v2013_v62 = vadd.f32 %v2729_v63, %v3786_v13  ;;  %v3832_v12 = vadd.f32 %v2790_v35, %v2010_v50 }
 0x264   : > { %v2799_v28 = vadd.f32 %v2798_v45, %v2797_v36 }
 0x265   : > { %v2730_v14 = vpop.f32.mrb[60].mxu1  ;;  %v3834_v57 = vadd.f32 %v2793_v10, %v2013_v62 }
 0x266   : > { %v2731_v42 = vpop.f32.mrb[61].mxu1 }
 0x267   : > { %v2732_v9 = vadd.f32 %v2731_v42, %v2730_v14  ;;  %v2733_v8 = vpop.f32.mrb[62].mxu1 }
 0x268   : > { %v2734_v19 = vpop.f32.mrb[63].mxu1 }
 0x269   : > { %v2018_v1 = vadd.f32 %v2732_v9, %v3790_v25  ;;  %v2735_v55 = vadd.f32 %v2734_v19, %v2733_v8 }
 0x26b   : > { %v2021_v11 = vadd.f32 %v2735_v55, %v3792_v2  ;;  %v3838_v6 = vadd.f32 %v2796_v18, %v2018_v1 }
 0x26d   : > { %v2870_v53 = vpop.f32.mrb[64].mxu1  ;;  %v3840_v13 = vadd.f32 %v2799_v28, %v2021_v11 }
 0x26e   : > { %v2164_v60 = vadd.f32 %v2870_v53, %v3802_v51  ;;  %v2155_v30 = vpop.f32.mrb[65].mxu1 }
 0x26f   : > { %v2156_v0 = vadd.f32 %v2155_v30, %v3796_v21  ;;  %v2871_v20 = vpop.f32.mrb[66].mxu1 }
 0x270   : > { %v2220_v35 = vmax.f32 %v2164_v60, 0.0  ;;  %v2167_v25 = vadd.f32 %v2871_v20, %v3804_v3  ;;  %v2158_v5 = vpop.f32.mrb[67].mxu1 }
 0x271   : > { %v2218_v47 = vmax.f32 %v2156_v0, 0.0  ;;  %v2159_v2 = vadd.f32 %v2158_v5, %v3798_v43 }
 0x272   : > { %v2236_v4 = vmin.f32 %v2220_v35, 6.0  ;;  %v2221_v10 = vmax.f32 %v2167_v25, 0.0 }
 0x273   : > { %v2234_v51 = vmin.f32 %v2218_v47, 6.0  ;;  %v2219_v21 = vmax.f32 %v2159_v2, 0.0 }
 0x274   : > { %v2252_v61 = vadd.f32 %v3004_v56, %v2236_v4  ;;  %v2237_v3 = vmin.f32 %v2221_v10, 6.0 }
 0x275   : > { %v2250_v29 = vadd.f32 %v3005_v48, %v2234_v51  ;;  %v2235_v43 = vmin.f32 %v2219_v21, 6.0  ;;  %v2874_v46 = vpop.f32.mrb[68].mxu1 }
 0x276   : > { %2268 = vst [vmem:[%s3851_s21 + $0x10] sm:$0xff] %v2252_v61  ;;  %v2253_v44 = vadd.f32 %v2237_v3, %v3180_v17  ;;  %v2180_v41 = vadd.f32 %v2874_v46, %v3814_v54  ;;  %v2171_v50 = vpop.f32.mrb[69].mxu1 }
 0x277   : > { %2266 = vst [vmem:[%s3851_s21] sm:$0xff] %v2250_v29  ;;  %v2251_v63 = vadd.f32 %v2235_v43, %v3176_v15  ;;  %v2172_v18 = vadd.f32 %v2171_v50, %v3808_v7  ;;  %v2875_v36 = vpop.f32.mrb[70].mxu1 }
 0x278   : > { %2269 = vst [vmem:[%s3851_s21 + $0x18] sm:$0xff] %v2253_v44  ;;  %v2224_v45 = vmax.f32 %v2180_v41, 0.0  ;;  %v2183_v62 = vadd.f32 %v2875_v36, %v3816_v58  ;;  %v2174_v28 = vpop.f32.mrb[71].mxu1 }
 0x279   : > { %2267 = vst [vmem:[%s3851_s21 + $0x8] sm:$0xff] %v2251_v63  ;;  %v2222_v14 = vmax.f32 %v2172_v18, 0.0  ;;  %v2175_v17 = vadd.f32 %v2174_v28, %v3810_v16 }
 0x27a   : > { %v2240_v42 = vmin.f32 %v2224_v45, 6.0  ;;  %v2225_v54 = vmax.f32 %v2183_v62, 0.0 }
 0x27b   : > { %v2238_v9 = vmin.f32 %v2222_v14, 6.0  ;;  %v2223_v8 = vmax.f32 %v2175_v17, 0.0 }
 0x27c   : > { %v2256_v15 = vadd.f32 %v2240_v42, %v3203_v26  ;;  %v2241_v7 = vmin.f32 %v2225_v54, 6.0 }
 0x27d   : > { %v2254_v19 = vadd.f32 %v2238_v9, %v3194_v23  ;;  %v2239_v1 = vmin.f32 %v2223_v8, 6.0  ;;  %v2878_v55 = vpop.f32.mrb[72].mxu1 }
 0x27e   : > { %2272 = vst [vmem:[%s3851_s21 + $0x30] sm:$0xff] %v2256_v15  ;;  %v2257_v58 = vadd.f32 %v2241_v7, %v3206_v27  ;;  %v2196_v11 = vadd.f32 %v2878_v55, %v3826_v49  ;;  %v2187_v53 = vpop.f32.mrb[73].mxu1 }
 0x27f   : > { %2270 = vst [vmem:[%s3851_s21 + $0x20] sm:$0xff] %v2254_v19  ;;  %v2255_v16 = vadd.f32 %v2239_v1, %v3197_v24  ;;  %v2188_v60 = vadd.f32 %v2187_v53, %v3820_v22  ;;  %v2879_v30 = vpop.f32.mrb[74].mxu1 }
 0x280   : > { %2273 = vst [vmem:[%s3851_s21 + $0x38] sm:$0xff] %v2257_v58  ;;  %v2228_v26 = vmax.f32 %v2196_v11, 0.0  ;;  %v2199_v0 = vadd.f32 %v2879_v30, %v3828_v59  ;;  %v2190_v23 = vpop.f32.mrb[75].mxu1 }
 0x281   : > { %2271 = vst [vmem:[%s3851_s21 + $0x28] sm:$0xff] %v2255_v16  ;;  %v2226_v20 = vmax.f32 %v2188_v60, 0.0  ;;  %v2191_v27 = vadd.f32 %v2190_v23, %v3822_v52 }
 0x282   : > { %v2244_v35 = vmin.f32 %v2228_v26, 6.0  ;;  %v2229_v49 = vmax.f32 %v2199_v0, 0.0 }
 0x283   : > { %v2242_v25 = vmin.f32 %v2226_v20, 6.0  ;;  %v2227_v5 = vmax.f32 %v2191_v27, 0.0 }
 0x284   : > { %v2260_v24 = vadd.f32 %v2244_v35, %v3222_v33  ;;  %v2245_v22 = vmin.f32 %v2229_v49, 6.0 }
 0x285   : > { %v2258_v47 = vadd.f32 %v2242_v25, %v3216_v31  ;;  %v2243_v2 = vmin.f32 %v2227_v5, 6.0  ;;  %v2882_v4 = vpop.f32.mrb[76].mxu1 }
 0x286   : > { %2276 = vst [vmem:[%s3851_s21 + $0x50] sm:$0xff] %v2260_v24  ;;  %v2261_v59 = vadd.f32 %v2245_v22, %v3225_v34  ;;  %v2212_v10 = vadd.f32 %v2882_v4, %v3838_v6  ;;  %v2203_v51 = vpop.f32.mrb[77].mxu1 }
 0x287   : > { %2274 = vst [vmem:[%s3851_s21 + $0x40] sm:$0xff] %v2258_v47  ;;  %v2259_v52 = vadd.f32 %v2243_v2, %v3219_v32  ;;  %v2204_v21 = vadd.f32 %v2203_v51, %v3832_v12  ;;  %v2883_v56 = vpop.f32.mrb[78].mxu1 }
 0x288   : > { %2277 = vst [vmem:[%s3851_s21 + $0x58] sm:$0xff] %v2261_v59  ;;  %v2232_v33 = vmax.f32 %v2212_v10, 0.0  ;;  %v2215_v31 = vadd.f32 %v2883_v56, %v3840_v13  ;;  %v2206_v61 = vpop.f32.mrb[79].mxu1 }
 0x289   : > { %2275 = vst [vmem:[%s3851_s21 + $0x48] sm:$0xff] %v2259_v52  ;;  %v2230_v34 = vmax.f32 %v2204_v21, 0.0  ;;  %v2207_v6 = vadd.f32 %v2206_v61, %v3834_v57 }
 0x28a   : > { %v2248_v3 = vmin.f32 %v2232_v33, 6.0  ;;  %v2233_v48 = vmax.f32 %v2215_v31, 0.0 }
 0x28b   : > { %v2246_v29 = vmin.f32 %v2230_v34, 6.0  ;;  %v2231_v32 = vmax.f32 %v2207_v6, 0.0 }
 0x28c   : > { %v2264_v12 = vadd.f32 %v2248_v3, %v3238_v39  ;;  %v2249_v43 = vmin.f32 %v2233_v48, 6.0 }
 0x28d   : > { %v2262_v46 = vadd.f32 %v2246_v29, %v3232_v37  ;;  %v2247_v44 = vmin.f32 %v2231_v32, 6.0 }
 0x28e   : > { %2280 = vst [vmem:[%s3851_s21 + $0x70] sm:$0xff] %v2264_v12  ;;  %v2265_v13 = vadd.f32 %v2249_v43, %v3241_v40 }
 0x28f   : > { %2278 = vst [vmem:[%s3851_s21 + $0x60] sm:$0xff] %v2262_v46  ;;  %v2263_v41 = vadd.f32 %v2247_v44, %v3235_v38 }
 0x290   : > { %2281 = vst [vmem:[%s3851_s21 + $0x78] sm:$0xff] %v2265_v13 }
 0x291   : > { %2279 = vst [vmem:[%s3851_s21 + $0x68] sm:$0xff] %v2263_v41 }
 0x292 PF: > { %s17_s28 = sadd.s32 1, %s3044_s28   ;;  %s3924_s24 = smov %s3036_s26 }
 0x293   : > { %p14_p9 = scmp.ge.s32.totalorder %s17_s28, 6   ;;  %s3925_s25 = smov %s3040_s27 }
 0x294   : > { %s3926_s26 = smov %s3929_s29  ;;  %s3927_s27 = smov %s3933_s30 }
 0x295   :  { %16 = sbr.rel (!%p14_p9) target bundleno = 3 (0x3), region = 84 }

</bundles_post_ra>
